<compile_context>
chip_gen: v7x
topology: tpu7x:2x2x1
jax: 0.10.0
libtpu: 0.0.40
codegen_flags: <defaults>
</compile_context>

<pallas_src>
import functools
import numpy as np

import jax
import jax.numpy as jnp
from jax.experimental import pallas as pl
from jax.experimental.pallas import tpu as pltpu


def _wmsa_kernel(q_ref, kv_ref, bias_ref, wq_ref, bq_ref, wkv_ref, bkv_ref,
                 wp_ref, bp_ref, o_ref, *, num_heads, head_dim, group,
                 num_windows, seq_q, seq_k):
    """One grid step processes TB = group * num_windows windows.

    q_ref:    (TB*Nq, C)      flattened query rows for this step
    kv_ref:   (TB*Nk, C)      flattened key/value rows
    bias_ref: (H, nW, Nq, Nk) rel-pos bias + window mask (resident in VMEM)
    o_ref:    (TB*Nq, C)
    """
    H, hd = num_heads, head_dim
    G, nW = group, num_windows
    Nq, Nk = seq_q, seq_k
    TB = G * nW
    C = H * hd
    mxu = wq_ref.dtype  # bf16: MXU operand dtype

    # ---- projections: big (rows, C) matmuls on the MXU (bf16 operands) ----
    # qk scale is already folded into wq/bq by the wrapper.
    q2 = q_ref[...].astype(mxu)                       # (TB*Nq, C)
    kv2 = kv_ref[...].astype(mxu)                     # (TB*Nk, C)
    qp = jnp.dot(q2, wq_ref[...],
                 preferred_element_type=jnp.float32) + bq_ref[...]
    kvp = jnp.dot(kv2, wkv_ref[...],
                  preferred_element_type=jnp.float32) + bkv_ref[...]

    q3 = qp.reshape(TB, Nq, C)                        # f32, heads along lanes
    k3 = kvp[:, :C].reshape(TB, Nk, C)
    v3 = kvp[:, C:].reshape(TB, Nk, C)

    # ---- attention per head (window-batched), softmax in f32 ----
    head_outs = []
    for h in range(H):                                # static unroll, H small
        sl = slice(h * hd, (h + 1) * hd)
        qh = q3[:, :, sl].astype(mxu)
        kh = k3[:, :, sl].astype(mxu)
        vh = v3[:, :, sl].astype(mxu)

        # scores for all TB windows of this head at once (leading-batch einsum)
        s = jnp.einsum('bqd,bkd->bqk', qh, kh,
                       preferred_element_type=jnp.float32)        # (TB,Nq,Nk)
        # grid-invariant combined bias (rel-pos bias + window mask), resident:
        # view scores as (G, nW, Nq, Nk) and broadcast-add (nW, Nq, Nk).
        s = s.reshape(G, nW, Nq, Nk) + bias_ref[h][None]
        # numerically stable softmax; divide goes to the EUP (approx recip)
        s = s - jnp.max(s, axis=-1, keepdims=True)
        p = jnp.exp(s)
        p = p * pl.reciprocal(jnp.sum(p, axis=-1, keepdims=True), approx=True)
        p = p.reshape(TB, Nq, Nk).astype(mxu)

        xh = jnp.einsum('bqk,bkd->bqd', p, vh,
                        preferred_element_type=jnp.float32)       # (TB,Nq,hd)
        head_outs.append(xh.reshape(TB * Nq, hd))

    # ---- head concat (contiguous lane writes) + ONE K=C output projection --
    x = jnp.concatenate(head_outs, axis=-1)                       # (TB*Nq, C)
    o = jnp.dot(x.astype(mxu), wp_ref[...],
                preferred_element_type=jnp.float32) + bp_ref[...]
    o_ref[...] = o.astype(o_ref.dtype)


def window_msa_pallas(q, kv, rel_bias, mask, wq, bq, wkv, bkv, wp, bp,
                      num_heads, qk_scale=None, group_batch=None,
                      vmem_limit_bytes=32 * 1024 * 1024):
    """WindowMSA forward.

    q:  (B, Nq, C)   B = num_windows * batch
    kv: (B, Nk, C)
    rel_bias: (H, Nq, Nk) relative position bias (already gathered & tiled)
    mask: (nW, Nq, Nk) additive window mask in (-inf, 0], or None
    Linear weights pre-transposed to (in_features, out_features): x @ W + b.
    """
    B, Nq, C = q.shape
    Nk = kv.shape[1]
    H = num_heads
    hd = C // H
    scale = qk_scale if qk_scale is not None else hd ** (-0.5)

    if mask is None:
        mask = jnp.zeros((1, Nq, Nk), jnp.float32)
    nW = mask.shape[0]
    assert B % nW == 0, "B must be a multiple of the number of windows"
    batch = B // nW

    # Fold the qk scale into the q projection (exact: scale*(xW+b)==x(sW)+(sb));
    # cast MXU weights to bf16 (halves weight DMA/VMEM); keep biases in f32.
    wq_s = (wq.astype(jnp.float32) * scale).astype(jnp.bfloat16)
    bq_s = (bq.astype(jnp.float32) * scale).reshape(1, C)
    wkv_b = wkv.astype(jnp.bfloat16)
    bkv_b = bkv.astype(jnp.float32).reshape(1, 2 * C)
    wp_b = wp.astype(jnp.bfloat16)
    bp_b = bp.astype(jnp.float32).reshape(1, C)

    # Combined grid-invariant bias: rel-pos bias + window mask, (H, nW, Nq, Nk).
    bias = rel_bias.astype(jnp.float32)[:, None] + mask.astype(jnp.float32)[None, :]

    # ---- choose windows-per-step (TB = G*nW) from a VMEM budget ----
    if group_batch is None:
        budget = int(vmem_limit_bytes * 0.75)
        resident = (bias.size * 4
                    + (wq_s.size + wkv_b.size + wp_b.size) * 2
                    + (bq_s.size + bkv_b.size + bp_b.size) * 4)
        in_item = q.dtype.itemsize

        def step_bytes(g):
            tb = g * nW
            # double-buffered q / kv / out blocks
            io = 2 * (tb * Nq * C + tb * Nk * C + tb * Nq * C) * in_item
            # f32 in-kernel intermediates: qp, kvp, x slab, scores/probs
            tmp = 4 * (tb * Nq * 3 * C + tb * Nk * 2 * C
                       + tb * Nq * C + 3 * tb * Nq * Nk)
            return io + tmp

        divisors = [g for g in range(1, batch + 1) if batch % g == 0]
        fit = [g for g in divisors if resident + step_bytes(g) <= budget] or [1]
        # Prefer >= 2 grid steps: keeps q/kv/out DMAs double-buffering against
        # compute and lets v7x's two TensorCores split the "parallel" grid.
        pref = [g for g in fit if batch // g >= 2]
        group_batch = max(pref or fit)

    G = group_batch
    assert batch % G == 0
    TB = G * nW
    if (TB * Nq) % 8 or (TB * Nk) % 8:
        assert G == batch, "block rows must be a multiple of 8 sublanes"
    grid = (batch // G,)

    # Flattened 2-D I/O slabs: no in-kernel input/output reshapes, same bytes.
    q2d = q.reshape(B * Nq, C)
    kv2d = kv.reshape(B * Nk, C)

    kernel = functools.partial(_wmsa_kernel, num_heads=H, head_dim=hd,
                               group=G, num_windows=nW, seq_q=Nq, seq_k=Nk)

    # Advisory cost estimate so XLA can schedule around this call.
    flops = int(2 * B * Nq * C * C            # q projection
                + 2 * B * Nk * C * 2 * C      # kv projection
                + 4 * B * Nq * Nk * C         # QK^T + P@V
                + 2 * B * Nq * C * C)         # output projection
    transcendentals = int(B * H * Nq * Nk)
    bytes_accessed = int(q2d.size * q2d.dtype.itemsize
                         + kv2d.size * kv2d.dtype.itemsize
                         + B * Nq * C * q.dtype.itemsize
                         + bias.size * 4
                         + (wq_s.size + wkv_b.size + wp_b.size) * 2
                         + (bq_s.size + bkv_b.size + bp_b.size) * 4)

    out2d = pl.pallas_call(
        kernel,
        out_shape=jax.ShapeDtypeStruct((B * Nq, C), q.dtype),
        grid_spec=pltpu.PrefetchScalarGridSpec(
            num_scalar_prefetch=0,
            grid=grid,
            in_specs=[
                pl.BlockSpec((TB * Nq, C), lambda b: (b, 0)),            # q rows
                pl.BlockSpec((TB * Nk, C), lambda b: (b, 0)),            # kv rows
                pl.BlockSpec((H, nW, Nq, Nk), lambda b: (0, 0, 0, 0)),   # bias+mask (resident)
                pl.BlockSpec((C, C), lambda b: (0, 0)),                  # Wq * scale (bf16)
                pl.BlockSpec((1, C), lambda b: (0, 0)),                  # bq * scale
                pl.BlockSpec((C, 2 * C), lambda b: (0, 0)),              # Wkv (bf16)
                pl.BlockSpec((1, 2 * C), lambda b: (0, 0)),              # bkv
                pl.BlockSpec((C, C), lambda b: (0, 0)),                  # Wproj (bf16)
                pl.BlockSpec((1, C), lambda b: (0, 0)),                  # bproj
            ],
            out_specs=pl.BlockSpec((TB * Nq, C), lambda b: (b, 0)),
        ),
        compiler_params=pltpu.CompilerParams(
            dimension_semantics=("parallel",),      # v7x megacore sharding
            vmem_limit_bytes=vmem_limit_bytes),
        cost_estimate=pl.CostEstimate(flops=flops,
                                      transcendentals=transcendentals,
                                      bytes_accessed=bytes_accessed),
    )(q2d, kv2d, bias, wq_s, bq_s, wkv_b, bkv_b, wp_b, bp_b)

    return out2d.reshape(B, Nq, C)


# ----------------------------- glue / reference -----------------------------

def double_step_seq(step1, len1, step2, len2):
    seq1 = jnp.arange(0, step1 * len1, step1)
    seq2 = jnp.arange(0, step2 * len2, step2)
    return (seq1[:, None] + seq2[None, :]).reshape(1, -1)


def relative_position_index(Wh, Ww):
    coords = double_step_seq(2 * Ww - 1, Wh, 1, Ww)    # (1, Wh*Ww)
    idx = coords + coords.T                            # (Wh*Ww, Wh*Ww)
    return jnp.flip(idx, axis=1)


def window_msa_ref(q, kv, rel_bias, mask, wq, bq, wkv, bkv, wp, bp,
                   num_heads, qk_scale=None):
    """Pure-JAX f32 reference mirroring the PyTorch forward."""
    B, Nq, C = q.shape
    Nk = kv.shape[1]
    hd = C // num_heads
    scale = qk_scale if qk_scale is not None else hd ** (-0.5)
    qp = q @ wq + bq                       # (B, Nq, C)
    kvp = kv @ wkv + bkv                   # (B, Nk, 2C)
    qh = qp.reshape(B, Nq, num_heads, hd).transpose(0, 2, 1, 3) * scale
    k = kvp[..., :C].reshape(B, Nk, num_heads, hd).transpose(0, 2, 1, 3)
    v = kvp[..., C:].reshape(B, Nk, num_heads, hd).transpose(0, 2, 1, 3)
    attn = jnp.einsum('bhqd,bhkd->bhqk', qh, k) + rel_bias[None]
    if mask is not None:
        nW = mask.shape[0]
        attn = attn.reshape(B // nW, nW, num_heads, Nq, Nk) + mask[None, :, None]
        attn = attn.reshape(B, num_heads, Nq, Nk)
    attn = jax.nn.softmax(attn, axis=-1)
    x = jnp.einsum('bhqk,bhkd->bhqd', attn, v).transpose(0, 2, 1, 3).reshape(B, Nq, C)
    return x @ wp + bp


if __name__ == "__main__":
    # Module hyperparameters (small, consistent with WindowMSA)
    embed_dims, num_heads = 32, 4
    Wh, Ww = 4, 4
    Nq = Wh * Ww
    Nk = Nq
    nW, batch = 4, 2
    B = nW * batch

    key = jax.random.PRNGKey(0)
    keys = jax.random.split(key, 10)
    q = jax.random.normal(keys[0], (B, Nq, embed_dims), jnp.float32)
    kv = jax.random.normal(keys[1], (B, Nk, embed_dims), jnp.float32)

    # Deterministic synthetic parameters (no checkpoint loading)
    wq = jax.random.normal(keys[2], (embed_dims, embed_dims), jnp.float32) * 0.05
    bq = jax.random.normal(keys[3], (1, embed_dims), jnp.float32) * 0.01
    wkv = jax.random.normal(keys[4], (embed_dims, 2 * embed_dims), jnp.float32) * 0.05
    bkv = jax.random.normal(keys[5], (1, 2 * embed_dims), jnp.float32) * 0.01
    wp = jax.random.normal(keys[6], (embed_dims, embed_dims), jnp.float32) * 0.05
    bp = jax.random.normal(keys[7], (1, embed_dims), jnp.float32) * 0.01
    rel_table = 0.02 * jax.random.truncated_normal(
        keys[8], -2.0, 2.0,
        ((2 * Wh - 1) * (2 * Ww - 1), num_heads), jnp.float32)
    # Optional attention mask (num_windows, Nq, Nk), values in (-inf, 0]
    mask = -10.0 * (jax.random.uniform(keys[9], (nW, Nq, Nk)) > 0.8).astype(jnp.float32)

    # Relative position bias: gather + permute (glue, not hot path).
    # NOTE: the repeat along Nk only makes sense when Nk == Nq (as in Swin).
    idx = relative_position_index(Wh, Ww)                                 # (Nq, Nq)
    rel_bias = rel_table[idx.reshape(-1)].reshape(Nq, Nq, num_heads)
    rel_bias = jnp.transpose(rel_bias, (2, 0, 1))                         # (H, Nq, Nq)
    rel_bias = jnp.tile(rel_bias, (1, 1, Nk // Nq))                       # (H, Nq, Nk)

    out = window_msa_pallas(q, kv, rel_bias, mask, wq, bq, wkv, bkv, wp, bp,
                            num_heads)
    out = jax.block_until_ready(out)

    ref = window_msa_ref(q, kv, rel_bias, mask, wq, bq, wkv, bkv, wp, bp,
                         num_heads)
    # Tolerance accounts for bf16 MXU operands and the EUP approx reciprocal.
    np.testing.assert_allclose(np.asarray(out), np.asarray(ref),
                               atol=2e-2, rtol=2e-2)
    print("KERNEL_OK")
</pallas_src>

<mosaic_0001>
module attributes {stable_mosaic.version = 11 : i64} {
  func.func @_wmsa_kernel(%arg0: i32, %arg1: memref<64x32xf32, #tpu.memory_space<vmem>>, %arg2: memref<64x32xf32, #tpu.memory_space<vmem>>, %arg3: memref<4x4x16x16xf32, #tpu.memory_space<vmem>>, %arg4: memref<32x32xbf16, #tpu.memory_space<vmem>>, %arg5: memref<1x32xf32, #tpu.memory_space<vmem>>, %arg6: memref<32x64xbf16, #tpu.memory_space<vmem>>, %arg7: memref<1x64xf32, #tpu.memory_space<vmem>>, %arg8: memref<32x32xbf16, #tpu.memory_space<vmem>>, %arg9: memref<1x32xf32, #tpu.memory_space<vmem>>, %arg10: memref<64x32xf32, #tpu.memory_space<vmem>>) attributes {dimension_semantics = [#tpu.dimension_semantics<parallel>], iteration_bounds = array<i64: 2>, scalar_prefetch = 0 : i64, scratch_operands = 0 : i64, tpu.core_type = #tpu.core_type<tc>, window_params = [{transform_indices = @transform_0, window_bounds = array<i64: 64, 32>}, {transform_indices = @transform_1, window_bounds = array<i64: 64, 32>}, {pipeline_mode = #tpu.pipeline_mode<synchronous>, transform_indices = @transform_2, window_bounds = array<i64: 4, 4, 16, 16>}, {pipeline_mode = #tpu.pipeline_mode<synchronous>, transform_indices = @transform_3, window_bounds = array<i64: 32, 32>}, {pipeline_mode = #tpu.pipeline_mode<synchronous>, transform_indices = @transform_4, window_bounds = array<i64: 1, 32>}, {pipeline_mode = #tpu.pipeline_mode<synchronous>, transform_indices = @transform_5, window_bounds = array<i64: 32, 64>}, {pipeline_mode = #tpu.pipeline_mode<synchronous>, transform_indices = @transform_6, window_bounds = array<i64: 1, 64>}, {pipeline_mode = #tpu.pipeline_mode<synchronous>, transform_indices = @transform_7, window_bounds = array<i64: 32, 32>}, {pipeline_mode = #tpu.pipeline_mode<synchronous>, transform_indices = @transform_8, window_bounds = array<i64: 1, 32>}, {transform_indices = @transform_9, window_bounds = array<i64: 64, 32>}]} {
    %c0 = arith.constant 0 : index
    %c0_0 = arith.constant 0 : index
    %0 = vector.load %arg1[%c0, %c0_0] : memref<64x32xf32, #tpu.memory_space<vmem>>, vector<64x32xf32>
    %1 = arith.truncf %0 : vector<64x32xf32> to vector<64x32xbf16>
    %c0_1 = arith.constant 0 : index
    %c0_2 = arith.constant 0 : index
    %2 = vector.load %arg2[%c0_1, %c0_2] : memref<64x32xf32, #tpu.memory_space<vmem>>, vector<64x32xf32>
    %3 = arith.truncf %2 : vector<64x32xf32> to vector<64x32xbf16>
    %c0_3 = arith.constant 0 : index
    %c0_4 = arith.constant 0 : index
    %4 = vector.load %arg4[%c0_3, %c0_4] : memref<32x32xbf16, #tpu.memory_space<vmem>>, vector<32x32xbf16>
    %cst = arith.constant dense<0.000000e+00> : vector<64x32xf32>
    %5 = tpu.matmul %1, %4, %cst {dimension_numbers = #tpu.dot_dimension_numbers<[1], [0], [0], [1], [0, 0, 1, 1], [], []>} : vector<64x32xbf16>, vector<32x32xbf16>, vector<64x32xf32> -> vector<64x32xf32>
    %c0_5 = arith.constant 0 : index
    %c0_6 = arith.constant 0 : index
    %6 = vector.load %arg5[%c0_5, %c0_6] : memref<1x32xf32, #tpu.memory_space<vmem>>, vector<1x32xf32>
    %7 = vector.broadcast %6 : vector<1x32xf32> to vector<64x32xf32>
    %8 = arith.addf %5, %7 : vector<64x32xf32>
    %c0_7 = arith.constant 0 : index
    %c0_8 = arith.constant 0 : index
    %9 = vector.load %arg6[%c0_7, %c0_8] : memref<32x64xbf16, #tpu.memory_space<vmem>>, vector<32x64xbf16>
    %cst_9 = arith.constant dense<0.000000e+00> : vector<64x64xf32>
    %10 = tpu.matmul %3, %9, %cst_9 {dimension_numbers = #tpu.dot_dimension_numbers<[1], [0], [0], [1], [0, 0, 1, 1], [], []>} : vector<64x32xbf16>, vector<32x64xbf16>, vector<64x64xf32> -> vector<64x64xf32>
    %c0_10 = arith.constant 0 : index
    %c0_11 = arith.constant 0 : index
    %11 = vector.load %arg7[%c0_10, %c0_11] : memref<1x64xf32, #tpu.memory_space<vmem>>, vector<1x64xf32>
    %12 = vector.broadcast %11 : vector<1x64xf32> to vector<64x64xf32>
    %13 = arith.addf %10, %12 : vector<64x64xf32>
    %14 = vector.shape_cast %8 : vector<64x32xf32> to vector<4x16x32xf32>
    %15 = vector.extract_strided_slice %13 {offsets = [0, 0], sizes = [64, 32], strides = [1, 1]} : vector<64x64xf32> to vector<64x32xf32>
    %16 = vector.shape_cast %15 : vector<64x32xf32> to vector<4x16x32xf32>
    %17 = vector.extract_strided_slice %13 {offsets = [0, 32], sizes = [64, 32], strides = [1, 1]} : vector<64x64xf32> to vector<64x32xf32>
    %18 = vector.shape_cast %17 : vector<64x32xf32> to vector<4x16x32xf32>
    %19 = vector.extract_strided_slice %14 {offsets = [0, 0, 0], sizes = [4, 16, 8], strides = [1, 1, 1]} : vector<4x16x32xf32> to vector<4x16x8xf32>
    %20 = arith.truncf %19 : vector<4x16x8xf32> to vector<4x16x8xbf16>
    %21 = vector.extract_strided_slice %16 {offsets = [0, 0, 0], sizes = [4, 16, 8], strides = [1, 1, 1]} : vector<4x16x32xf32> to vector<4x16x8xf32>
    %22 = arith.truncf %21 : vector<4x16x8xf32> to vector<4x16x8xbf16>
    %23 = vector.extract_strided_slice %18 {offsets = [0, 0, 0], sizes = [4, 16, 8], strides = [1, 1, 1]} : vector<4x16x32xf32> to vector<4x16x8xf32>
    %24 = arith.truncf %23 : vector<4x16x8xf32> to vector<4x16x8xbf16>
    "tpu.trace_start"() <{level = 10 : i32, message = "bqd,bkd->bqk"}> : () -> ()
    %cst_12 = arith.constant dense<0.000000e+00> : vector<4x16x16xf32>
    %25 = tpu.matmul %20, %22, %cst_12 {dimension_numbers = #tpu.dot_dimension_numbers<[2], [2], [1], [1], [0, 0, 0, 1, 1, 1], [0], [0]>} : vector<4x16x8xbf16>, vector<4x16x8xbf16>, vector<4x16x16xf32> -> vector<4x16x16xf32>
    "tpu.trace_stop"() : () -> ()
    %26 = vector.shape_cast %25 : vector<4x16x16xf32> to vector<1x4x16x16xf32>
    %c0_13 = arith.constant 0 : index
    %c0_14 = arith.constant 0 : index
    %c0_15 = arith.constant 0 : index
    %c0_16 = arith.constant 0 : index
    %27 = vector.load %arg3[%c0_13, %c0_14, %c0_15, %c0_16] : memref<4x4x16x16xf32, #tpu.memory_space<vmem>>, vector<1x4x16x16xf32>
    %28 = vector.shape_cast %27 : vector<1x4x16x16xf32> to vector<4x16x16xf32>
    %29 = vector.shape_cast %28 : vector<4x16x16xf32> to vector<1x4x16x16xf32>
    %30 = arith.addf %26, %29 : vector<1x4x16x16xf32>
    %cst_17 = arith.constant dense<0xFF800000> : vector<1x4x16xf32>
    %31 = vector.multi_reduction <maximumf>, %30, %cst_17 [3] : vector<1x4x16x16xf32> to vector<1x4x16xf32>
    %32 = vector.shape_cast %31 : vector<1x4x16xf32> to vector<1x4x16x1xf32>
    %33 = vector.broadcast %32 : vector<1x4x16x1xf32> to vector<1x4x16x16xf32>
    %34 = arith.subf %30, %33 : vector<1x4x16x16xf32>
    %35 = math.exp %34 : vector<1x4x16x16xf32>
    %cst_18 = arith.constant dense<0.000000e+00> : vector<1x4x16xf32>
    %36 = vector.multi_reduction <add>, %35, %cst_18 [3] : vector<1x4x16x16xf32> to vector<1x4x16xf32>
    %37 = vector.shape_cast %36 : vector<1x4x16xf32> to vector<1x4x16x1xf32>
    %38 = tpu.reciprocal %37 {approx = true} : vector<1x4x16x1xf32> -> vector<1x4x16x1xf32>
    %39 = vector.broadcast %38 : vector<1x4x16x1xf32> to vector<1x4x16x16xf32>
    %40 = arith.mulf %35, %39 : vector<1x4x16x16xf32>
    %41 = vector.shape_cast %40 : vector<1x4x16x16xf32> to vector<4x16x16xf32>
    %42 = arith.truncf %41 : vector<4x16x16xf32> to vector<4x16x16xbf16>
    "tpu.trace_start"() <{level = 10 : i32, message = "bqk,bkd->bqd"}> : () -> ()
    %cst_19 = arith.constant dense<0.000000e+00> : vector<4x16x8xf32>
    %43 = tpu.matmul %42, %24, %cst_19 {dimension_numbers = #tpu.dot_dimension_numbers<[2], [1], [1], [2], [0, 0, 0, 1, 1, 2], [0], [0]>} : vector<4x16x16xbf16>, vector<4x16x8xbf16>, vector<4x16x8xf32> -> vector<4x16x8xf32>
    "tpu.trace_stop"() : () -> ()
    %44 = vector.shape_cast %43 : vector<4x16x8xf32> to vector<64x8xf32>
    %45 = vector.extract_strided_slice %14 {offsets = [0, 0, 8], sizes = [4, 16, 8], strides = [1, 1, 1]} : vector<4x16x32xf32> to vector<4x16x8xf32>
    %46 = arith.truncf %45 : vector<4x16x8xf32> to vector<4x16x8xbf16>
    %47 = vector.extract_strided_slice %16 {offsets = [0, 0, 8], sizes = [4, 16, 8], strides = [1, 1, 1]} : vector<4x16x32xf32> to vector<4x16x8xf32>
    %48 = arith.truncf %47 : vector<4x16x8xf32> to vector<4x16x8xbf16>
    %49 = vector.extract_strided_slice %18 {offsets = [0, 0, 8], sizes = [4, 16, 8], strides = [1, 1, 1]} : vector<4x16x32xf32> to vector<4x16x8xf32>
    %50 = arith.truncf %49 : vector<4x16x8xf32> to vector<4x16x8xbf16>
    "tpu.trace_start"() <{level = 10 : i32, message = "bqd,bkd->bqk"}> : () -> ()
    %cst_20 = arith.constant dense<0.000000e+00> : vector<4x16x16xf32>
    %51 = tpu.matmul %46, %48, %cst_20 {dimension_numbers = #tpu.dot_dimension_numbers<[2], [2], [1], [1], [0, 0, 0, 1, 1, 1], [0], [0]>} : vector<4x16x8xbf16>, vector<4x16x8xbf16>, vector<4x16x16xf32> -> vector<4x16x16xf32>
    "tpu.trace_stop"() : () -> ()
    %52 = vector.shape_cast %51 : vector<4x16x16xf32> to vector<1x4x16x16xf32>
    %c1 = arith.constant 1 : index
    %c0_21 = arith.constant 0 : index
    %c0_22 = arith.constant 0 : index
    %c0_23 = arith.constant 0 : index
    %53 = vector.load %arg3[%c1, %c0_21, %c0_22, %c0_23] : memref<4x4x16x16xf32, #tpu.memory_space<vmem>>, vector<1x4x16x16xf32>
    %54 = vector.shape_cast %53 : vector<1x4x16x16xf32> to vector<4x16x16xf32>
    %55 = vector.shape_cast %54 : vector<4x16x16xf32> to vector<1x4x16x16xf32>
    %56 = arith.addf %52, %55 : vector<1x4x16x16xf32>
    %cst_24 = arith.constant dense<0xFF800000> : vector<1x4x16xf32>
    %57 = vector.multi_reduction <maximumf>, %56, %cst_24 [3] : vector<1x4x16x16xf32> to vector<1x4x16xf32>
    %58 = vector.shape_cast %57 : vector<1x4x16xf32> to vector<1x4x16x1xf32>
    %59 = vector.broadcast %58 : vector<1x4x16x1xf32> to vector<1x4x16x16xf32>
    %60 = arith.subf %56, %59 : vector<1x4x16x16xf32>
    %61 = math.exp %60 : vector<1x4x16x16xf32>
    %cst_25 = arith.constant dense<0.000000e+00> : vector<1x4x16xf32>
    %62 = vector.multi_reduction <add>, %61, %cst_25 [3] : vector<1x4x16x16xf32> to vector<1x4x16xf32>
    %63 = vector.shape_cast %62 : vector<1x4x16xf32> to vector<1x4x16x1xf32>
    %64 = tpu.reciprocal %63 {approx = true} : vector<1x4x16x1xf32> -> vector<1x4x16x1xf32>
    %65 = vector.broadcast %64 : vector<1x4x16x1xf32> to vector<1x4x16x16xf32>
    %66 = arith.mulf %61, %65 : vector<1x4x16x16xf32>
    %67 = vector.shape_cast %66 : vector<1x4x16x16xf32> to vector<4x16x16xf32>
    %68 = arith.truncf %67 : vector<4x16x16xf32> to vector<4x16x16xbf16>
    "tpu.trace_start"() <{level = 10 : i32, message = "bqk,bkd->bqd"}> : () -> ()
    %cst_26 = arith.constant dense<0.000000e+00> : vector<4x16x8xf32>
    %69 = tpu.matmul %68, %50, %cst_26 {dimension_numbers = #tpu.dot_dimension_numbers<[2], [1], [1], [2], [0, 0, 0, 1, 1, 2], [0], [0]>} : vector<4x16x16xbf16>, vector<4x16x8xbf16>, vector<4x16x8xf32> -> vector<4x16x8xf32>
    "tpu.trace_stop"() : () -> ()
    %70 = vector.shape_cast %69 : vector<4x16x8xf32> to vector<64x8xf32>
    %71 = vector.extract_strided_slice %14 {offsets = [0, 0, 16], sizes = [4, 16, 8], strides = [1, 1, 1]} : vector<4x16x32xf32> to vector<4x16x8xf32>
    %72 = arith.truncf %71 : vector<4x16x8xf32> to vector<4x16x8xbf16>
    %73 = vector.extract_strided_slice %16 {offsets = [0, 0, 16], sizes = [4, 16, 8], strides = [1, 1, 1]} : vector<4x16x32xf32> to vector<4x16x8xf32>
    %74 = arith.truncf %73 : vector<4x16x8xf32> to vector<4x16x8xbf16>
    %75 = vector.extract_strided_slice %18 {offsets = [0, 0, 16], sizes = [4, 16, 8], strides = [1, 1, 1]} : vector<4x16x32xf32> to vector<4x16x8xf32>
    %76 = arith.truncf %75 : vector<4x16x8xf32> to vector<4x16x8xbf16>
    "tpu.trace_start"() <{level = 10 : i32, message = "bqd,bkd->bqk"}> : () -> ()
    %cst_27 = arith.constant dense<0.000000e+00> : vector<4x16x16xf32>
    %77 = tpu.matmul %72, %74, %cst_27 {dimension_numbers = #tpu.dot_dimension_numbers<[2], [2], [1], [1], [0, 0, 0, 1, 1, 1], [0], [0]>} : vector<4x16x8xbf16>, vector<4x16x8xbf16>, vector<4x16x16xf32> -> vector<4x16x16xf32>
    "tpu.trace_stop"() : () -> ()
    %78 = vector.shape_cast %77 : vector<4x16x16xf32> to vector<1x4x16x16xf32>
    %c2 = arith.constant 2 : index
    %c0_28 = arith.constant 0 : index
    %c0_29 = arith.constant 0 : index
    %c0_30 = arith.constant 0 : index
    %79 = vector.load %arg3[%c2, %c0_28, %c0_29, %c0_30] : memref<4x4x16x16xf32, #tpu.memory_space<vmem>>, vector<1x4x16x16xf32>
    %80 = vector.shape_cast %79 : vector<1x4x16x16xf32> to vector<4x16x16xf32>
    %81 = vector.shape_cast %80 : vector<4x16x16xf32> to vector<1x4x16x16xf32>
    %82 = arith.addf %78, %81 : vector<1x4x16x16xf32>
    %cst_31 = arith.constant dense<0xFF800000> : vector<1x4x16xf32>
    %83 = vector.multi_reduction <maximumf>, %82, %cst_31 [3] : vector<1x4x16x16xf32> to vector<1x4x16xf32>
    %84 = vector.shape_cast %83 : vector<1x4x16xf32> to vector<1x4x16x1xf32>
    %85 = vector.broadcast %84 : vector<1x4x16x1xf32> to vector<1x4x16x16xf32>
    %86 = arith.subf %82, %85 : vector<1x4x16x16xf32>
    %87 = math.exp %86 : vector<1x4x16x16xf32>
    %cst_32 = arith.constant dense<0.000000e+00> : vector<1x4x16xf32>
    %88 = vector.multi_reduction <add>, %87, %cst_32 [3] : vector<1x4x16x16xf32> to vector<1x4x16xf32>
    %89 = vector.shape_cast %88 : vector<1x4x16xf32> to vector<1x4x16x1xf32>
    %90 = tpu.reciprocal %89 {approx = true} : vector<1x4x16x1xf32> -> vector<1x4x16x1xf32>
    %91 = vector.broadcast %90 : vector<1x4x16x1xf32> to vector<1x4x16x16xf32>
    %92 = arith.mulf %87, %91 : vector<1x4x16x16xf32>
    %93 = vector.shape_cast %92 : vector<1x4x16x16xf32> to vector<4x16x16xf32>
    %94 = arith.truncf %93 : vector<4x16x16xf32> to vector<4x16x16xbf16>
    "tpu.trace_start"() <{level = 10 : i32, message = "bqk,bkd->bqd"}> : () -> ()
    %cst_33 = arith.constant dense<0.000000e+00> : vector<4x16x8xf32>
    %95 = tpu.matmul %94, %76, %cst_33 {dimension_numbers = #tpu.dot_dimension_numbers<[2], [1], [1], [2], [0, 0, 0, 1, 1, 2], [0], [0]>} : vector<4x16x16xbf16>, vector<4x16x8xbf16>, vector<4x16x8xf32> -> vector<4x16x8xf32>
    "tpu.trace_stop"() : () -> ()
    %96 = vector.shape_cast %95 : vector<4x16x8xf32> to vector<64x8xf32>
    %97 = vector.extract_strided_slice %14 {offsets = [0, 0, 24], sizes = [4, 16, 8], strides = [1, 1, 1]} : vector<4x16x32xf32> to vector<4x16x8xf32>
    %98 = arith.truncf %97 : vector<4x16x8xf32> to vector<4x16x8xbf16>
    %99 = vector.extract_strided_slice %16 {offsets = [0, 0, 24], sizes = [4, 16, 8], strides = [1, 1, 1]} : vector<4x16x32xf32> to vector<4x16x8xf32>
    %100 = arith.truncf %99 : vector<4x16x8xf32> to vector<4x16x8xbf16>
    %101 = vector.extract_strided_slice %18 {offsets = [0, 0, 24], sizes = [4, 16, 8], strides = [1, 1, 1]} : vector<4x16x32xf32> to vector<4x16x8xf32>
    %102 = arith.truncf %101 : vector<4x16x8xf32> to vector<4x16x8xbf16>
    "tpu.trace_start"() <{level = 10 : i32, message = "bqd,bkd->bqk"}> : () -> ()
    %cst_34 = arith.constant dense<0.000000e+00> : vector<4x16x16xf32>
    %103 = tpu.matmul %98, %100, %cst_34 {dimension_numbers = #tpu.dot_dimension_numbers<[2], [2], [1], [1], [0, 0, 0, 1, 1, 1], [0], [0]>} : vector<4x16x8xbf16>, vector<4x16x8xbf16>, vector<4x16x16xf32> -> vector<4x16x16xf32>
    "tpu.trace_stop"() : () -> ()
    %104 = vector.shape_cast %103 : vector<4x16x16xf32> to vector<1x4x16x16xf32>
    %c3 = arith.constant 3 : index
    %c0_35 = arith.constant 0 : index
    %c0_36 = arith.constant 0 : index
    %c0_37 = arith.constant 0 : index
    %105 = vector.load %arg3[%c3, %c0_35, %c0_36, %c0_37] : memref<4x4x16x16xf32, #tpu.memory_space<vmem>>, vector<1x4x16x16xf32>
    %106 = vector.shape_cast %105 : vector<1x4x16x16xf32> to vector<4x16x16xf32>
    %107 = vector.shape_cast %106 : vector<4x16x16xf32> to vector<1x4x16x16xf32>
    %108 = arith.addf %104, %107 : vector<1x4x16x16xf32>
    %cst_38 = arith.constant dense<0xFF800000> : vector<1x4x16xf32>
    %109 = vector.multi_reduction <maximumf>, %108, %cst_38 [3] : vector<1x4x16x16xf32> to vector<1x4x16xf32>
    %110 = vector.shape_cast %109 : vector<1x4x16xf32> to vector<1x4x16x1xf32>
    %111 = vector.broadcast %110 : vector<1x4x16x1xf32> to vector<1x4x16x16xf32>
    %112 = arith.subf %108, %111 : vector<1x4x16x16xf32>
    %113 = math.exp %112 : vector<1x4x16x16xf32>
    %cst_39 = arith.constant dense<0.000000e+00> : vector<1x4x16xf32>
    %114 = vector.multi_reduction <add>, %113, %cst_39 [3] : vector<1x4x16x16xf32> to vector<1x4x16xf32>
    %115 = vector.shape_cast %114 : vector<1x4x16xf32> to vector<1x4x16x1xf32>
    %116 = tpu.reciprocal %115 {approx = true} : vector<1x4x16x1xf32> -> vector<1x4x16x1xf32>
    %117 = vector.broadcast %116 : vector<1x4x16x1xf32> to vector<1x4x16x16xf32>
    %118 = arith.mulf %113, %117 : vector<1x4x16x16xf32>
    %119 = vector.shape_cast %118 : vector<1x4x16x16xf32> to vector<4x16x16xf32>
    %120 = arith.truncf %119 : vector<4x16x16xf32> to vector<4x16x16xbf16>
    "tpu.trace_start"() <{level = 10 : i32, message = "bqk,bkd->bqd"}> : () -> ()
    %cst_40 = arith.constant dense<0.000000e+00> : vector<4x16x8xf32>
    %121 = tpu.matmul %120, %102, %cst_40 {dimension_numbers = #tpu.dot_dimension_numbers<[2], [1], [1], [2], [0, 0, 0, 1, 1, 2], [0], [0]>} : vector<4x16x16xbf16>, vector<4x16x8xbf16>, vector<4x16x8xf32> -> vector<4x16x8xf32>
    "tpu.trace_stop"() : () -> ()
    %122 = vector.shape_cast %121 : vector<4x16x8xf32> to vector<64x8xf32>
    %123 = tpu.concatenate %44, %70, %96, %122 in 1 : vector<64x8xf32>, vector<64x8xf32>, vector<64x8xf32>, vector<64x8xf32> -> vector<64x32xf32>
    %124 = arith.truncf %123 : vector<64x32xf32> to vector<64x32xbf16>
    %c0_41 = arith.constant 0 : index
    %c0_42 = arith.constant 0 : index
    %125 = vector.load %arg8[%c0_41, %c0_42] : memref<32x32xbf16, #tpu.memory_space<vmem>>, vector<32x32xbf16>
    %cst_43 = arith.constant dense<0.000000e+00> : vector<64x32xf32>
    %126 = tpu.matmul %124, %125, %cst_43 {dimension_numbers = #tpu.dot_dimension_numbers<[1], [0], [0], [1], [0, 0, 1, 1], [], []>} : vector<64x32xbf16>, vector<32x32xbf16>, vector<64x32xf32> -> vector<64x32xf32>
    %c0_44 = arith.constant 0 : index
    %c0_45 = arith.constant 0 : index
    %127 = vector.load %arg9[%c0_44, %c0_45] : memref<1x32xf32, #tpu.memory_space<vmem>>, vector<1x32xf32>
    %128 = vector.broadcast %127 : vector<1x32xf32> to vector<64x32xf32>
    %129 = arith.addf %126, %128 : vector<64x32xf32>
    %c0_46 = arith.constant 0 : index
    %c0_47 = arith.constant 0 : index
    %130 = vector.load %arg10[%c0_46, %c0_47] : memref<64x32xf32, #tpu.memory_space<vmem>>, vector<64x32xf32>
    tpu.vector_store %arg10[%c0_46, %c0_47], %129 {strides = array<i32>} : memref<64x32xf32, #tpu.memory_space<vmem>>, vector<64x32xf32>,
    return
  }
  func.func @transform_0(%arg0: i32) -> (i32, i32) {
    %c0_i32 = arith.constant 0 : i32
    %c0_i32_0 = arith.constant 0 : i32
    return %arg0, %c0_i32 : i32, i32
  }
  func.func @transform_1(%arg0: i32) -> (i32, i32) {
    %c0_i32 = arith.constant 0 : i32
    %c0_i32_0 = arith.constant 0 : i32
    return %arg0, %c0_i32 : i32, i32
  }
  func.func @transform_2(%arg0: i32) -> (i32, i32, i32, i32) {
    %c0_i32 = arith.constant 0 : i32
    %c0_i32_0 = arith.constant 0 : i32
    %c0_i32_1 = arith.constant 0 : i32
    %c0_i32_2 = arith.constant 0 : i32
    %c0_i32_3 = arith.constant 0 : i32
    return %c0_i32, %c0_i32_0, %c0_i32_1, %c0_i32_2 : i32, i32, i32, i32
  }
  func.func @transform_3(%arg0: i32) -> (i32, i32) {
    %c0_i32 = arith.constant 0 : i32
    %c0_i32_0 = arith.constant 0 : i32
    %c0_i32_1 = arith.constant 0 : i32
    return %c0_i32, %c0_i32_0 : i32, i32
  }
  func.func @transform_4(%arg0: i32) -> (i32, i32) {
    %c0_i32 = arith.constant 0 : i32
    %c0_i32_0 = arith.constant 0 : i32
    %c0_i32_1 = arith.constant 0 : i32
    return %c0_i32, %c0_i32_0 : i32, i32
  }
  func.func @transform_5(%arg0: i32) -> (i32, i32) {
    %c0_i32 = arith.constant 0 : i32
    %c0_i32_0 = arith.constant 0 : i32
    %c0_i32_1 = arith.constant 0 : i32
    return %c0_i32, %c0_i32_0 : i32, i32
  }
  func.func @transform_6(%arg0: i32) -> (i32, i32) {
    %c0_i32 = arith.constant 0 : i32
    %c0_i32_0 = arith.constant 0 : i32
    %c0_i32_1 = arith.constant 0 : i32
    return %c0_i32, %c0_i32_0 : i32, i32
  }
  func.func @transform_7(%arg0: i32) -> (i32, i32) {
    %c0_i32 = arith.constant 0 : i32
    %c0_i32_0 = arith.constant 0 : i32
    %c0_i32_1 = arith.constant 0 : i32
    return %c0_i32, %c0_i32_0 : i32, i32
  }
  func.func @transform_8(%arg0: i32) -> (i32, i32) {
    %c0_i32 = arith.constant 0 : i32
    %c0_i32_0 = arith.constant 0 : i32
    %c0_i32_1 = arith.constant 0 : i32
    return %c0_i32, %c0_i32_0 : i32, i32
  }
  func.func @transform_9(%arg0: i32) -> (i32, i32) {
    %c0_i32 = arith.constant 0 : i32
    %c0_i32_0 = arith.constant 0 : i32
    return %arg0, %c0_i32 : i32, i32
  }
}

</mosaic_0001>

<bundles_post_ra>
// kernel: tpu_custom_call.1
= control target key start
LH: loop header
LB: loop body
LE: loop exit
PB: predicated region body
PF: predicated region fallthrough
CT: control target
= control target key end

     0   :  { %s3578_s30 = smov 0   ;;  %s4232_s0 = inlined_call_operand.vmem [shape: f32[128,32], index: 0, kind: input, shape index: {}]   ;;  %s4233_s1 = inlined_call_operand.vmem [shape: f32[128,32], index: 1, kind: input, shape index: {}]   ;;  %s4234_s2 = inlined_call_operand.vmem [shape: f32[4,4,16,16], index: 2, kind: input, shape index: {}]   ;;  %s4235_s3 = inlined_call_operand.vmem [shape: bf16[32,32], index: 3, kind: input, shape index: {}]   ;;  %s4236_s4 = inlined_call_operand.vmem [shape: f32[1,32], index: 4, kind: input, shape index: {}]   ;;  %s4237_s5 = inlined_call_operand.vmem [shape: bf16[32,64], index: 5, kind: input, shape index: {}]   ;;  %s4238_s6 = inlined_call_operand.vmem [shape: f32[1,64], index: 6, kind: input, shape index: {}]   ;;  %s4239_s7 = inlined_call_operand.vmem [shape: bf16[32,32], index: 7, kind: input, shape index: {}]   ;;  %s4240_s8 = inlined_call_operand.vmem [shape: f32[1,32], index: 8, kind: input, shape index: {}]   ;;  %s4241_s9 = inlined_call_operand.vmem [shape: f32[128,32], index: 9, kind: output, shape index: {}]  }
   0x1 LB: > { %s2890_s10 = sadd.s32 4294967295, %s3514_s30   ;;  %p2894_p0 = scmp.ge.s32.totalorder %s3514_s30, 1  ;;  %s3514_s30 = sphi %s3578_s30, %s19_s30  }
   0x2   : > { %p299_p1 = scmp.lt.s32.totalorder %s3514_s30, 3 }
   0x4   : > { %p300_p2 = pnand %p2894_p0, %p299_p1 }
   0x5   : > { %v3374_v0 = vld [vmem:[%s4235_s3] sm:$0xff] (!%p300_p2)   ;;  %s2895_s13 = sshll.u32 (!%p300_p2), %s2890_s10, 3  ;;  %v3375_v1 = vld [vmem:[%s4235_s3 + $0x8] sm:$0xff] (!%p300_p2)   ;;  %vm406_vm0 = vcmask (!%p300_p2), 261120   ;;  %v3516_v28 = vmov (!%p300_p2), 0.0   ;;  %vm3517_vm1 = vmmov (!%p300_p2), 0  }
   0x6   : > { %303 = sbr.rel (%p300_p2) target bundleno = 3221 (0xc95), region = 56  ;;  %p341_p3 = scmp.lt.s32.totalorder (!%p300_p2), %s2895_s13, 15  ;;  %3290 = vmatprep.subr.bf16.mxu1 (!%p300_p2), %v3374_v0  ;;  %3062 = vmatprep.subr.bf16.mxu0 (!%p300_p2), %v3374_v0  ;;  %v3376_v2 = vld [vmem:[%s4237_s5] sm:$0xff] (!%p300_p2)   ;;  %v3377_v11 = vld [vmem:[%s4237_s5 + $0x8] sm:$0xff] (!%p300_p2)   ;;  %vm592_vm2 = vcmask (!%p300_p2), 64512   ;;  %vm797_vm3 = vcmask (!%p300_p2), 130048  }
   0x7   : > { %3292 = vmatpush3.bf16.msra.mxu1 (!%p300_p2), %v3374_v0  ;;  %3063 = vmatpush3.bf16.msra.mxu0 (!%p300_p2), %v3374_v0  ;;  %v2901_v29 = vld [vmem:[%s4236_s4] ss:$0 sm:$0xff] (!%p300_p2)  ;;  %s3519_s29 = smov (!%p300_p2), 120   ;;  %s3520_s23 = smov (!%p300_p2), 88   ;;  %vm2701_vm4 = vcmask (!%p300_p2), 195584  }
   0x8   : > { %3291 = vmatprep.subr.bf16.mxu1 (!%p300_p2), %v3375_v1  ;;  %3064 = vmatprep.subr.bf16.mxu0 (!%p300_p2), %v3375_v1  ;;  %v2908_v49 = vld [vmem:[%s4238_s6] ss:$0 sm:$0xff] (!%p300_p2)  ;;  %s3521_s28 = smov (!%p300_p2), 112   ;;  %s3522_s22 = smov (!%p300_p2), 80  }
   0x9   : > { %s3523_s27 = smov (!%p300_p2), 104   ;;  %s3524_s25 = smov (!%p300_p2), 72  }
   0xa   : > { %s3525_s26 = smov (!%p300_p2), 8   ;;  %s3527_s12 = smov (!%p300_p2), 24  }
   0xb   : > { %3293 = vmatpush3.bf16.msra.mxu1 (!%p300_p2), %v3375_v1  ;;  %3065 = vmatpush3.bf16.msra.mxu0 (!%p300_p2), %v3375_v1 }
   0xc   : > { %3074 = vmatprep.subr.bf16.mxu1 (!%p300_p2), %v3376_v2  ;;  %3086 = vmatprep.subr.bf16.mxu0 (!%p300_p2), %v3516_v28 }
   0xd   : > { %s4243_s13 = smov (!%p341_p3, %s2895_s13), 15 }
   0xe   : > { %s3595_s18 = sshll.u32 %s4243_s13, 3 }
   0xf   : > { %s344_s21 = scalar_lea.vmem %s4232_s0, %s3595_s18  ;;  %s3605_s24 = scalar_lea.vmem %s4233_s1, %s3595_s18 }
  0x10   : > { %v363_v3 = vld [vmem:[%s344_s21 + $0x20] sm:$0xff]  ;;  %v364_v4 = vld [vmem:[%s344_s21 + $0x28] sm:$0xff]  ;;  %v365_v5 = vld [vmem:[%s344_s21 + $0x30] sm:$0xff]  ;;  %s356_s17 = scalar_lea.vmem %s4241_s9, %s3595_s18 }
  0x11   : > { %v369_v6 = vpack.c.bf16 %v364_v4, %v363_v3  ;;  %v366_v7 = vld [vmem:[%s344_s21 + $0x38] sm:$0xff]  ;;  %v371_v8 = vld [vmem:[%s3605_s24] sm:$0xff]  ;;  %v372_v9 = vld [vmem:[%s3605_s24 + $0x8] sm:$0xff] }
  0x12   : > { %v370_v10 = vpack.c.bf16 %v366_v7, %v365_v5  ;;  %v379_v12 = vpack.c.bf16 %v372_v9, %v371_v8  ;;  %v359_v13 = vld [vmem:[%s344_s21] sm:$0xff]  ;;  %v360_v14 = vld [vmem:[%s344_s21 + $0x8] sm:$0xff]  ;;  %v361_v16 = vld [vmem:[%s344_s21 + $0x10] sm:$0xff] }
  0x13   : > { %3070 = vmatprep.mubr.msk.bf16.mxu1 %vm406_vm0, %v369_v6  ;;  %v367_v15 = vpack.c.bf16 %v360_v14, %v359_v13  ;;  %v362_v17 = vld [vmem:[%s344_s21 + $0x18] sm:$0xff]  ;;  %v373_v18 = vld [vmem:[%s3605_s24 + $0x10] sm:$0xff]  ;;  %v375_v21 = vld [vmem:[%s3605_s24 + $0x20] sm:$0xff] }
  0x14   : > { %3071 = vmatmul.mubr.msk.bf16.vlgmr.msra.gmra.mrb[0].mxu1 %vm406_vm0, %v370_v10  ;;  %v374_v19 = vld [vmem:[%s3605_s24 + $0x18] sm:$0xff]  ;;  %v368_v20 = vpack.c.bf16 %v362_v17, %v361_v16  ;;  %v376_v22 = vld [vmem:[%s3605_s24 + $0x28] sm:$0xff]  ;;  %v377_v25 = vld [vmem:[%s3605_s24 + $0x30] sm:$0xff] }
  0x15   : > { %3075 = vmatpush3.bf16.msra.mxu1 %v3376_v2  ;;  %3078 = vmatprep.mubr.msk.bf16.mxu1 %vm406_vm0, %v379_v12  ;;  %v380_v23 = vpack.c.bf16 %v374_v19, %v373_v18  ;;  %v381_v24 = vpack.c.bf16 %v376_v22, %v375_v21  ;;  %v378_v26 = vld [vmem:[%s3605_s24 + $0x38] sm:$0xff]  ;;  %v781_v12 = vld [vmem:[%s4234_s2] sm:$0xff]  ;;  %v782_v18 = vld [vmem:[%s4234_s2 + $0x8] sm:$0xff]  ;;  %s3518_s24 = smov 96  }
  0x16   : > { %3076 = vmatprep.subr.bf16.mxu1 %v3377_v11  ;;  %3066 = vmatprep.mubr.msk.bf16.mxu0 %vm406_vm0, %v367_v15  ;;  %v382_v27 = vpack.c.bf16 %v378_v26, %v377_v25  ;;  %v784_v14 = vld [vmem:[%s4234_s2 + $0x18] sm:$0xff] }
  0x17   : > { %3067 = vmatmul.mubr.msk.bf16.vlgmr.msra.gmra.mrb[0].mxu0 %vm406_vm0, %v368_v20 }
  0x18   : > { %3088 = vmatprep.mubr.msk.bf16.mxu0 %vm3517_vm1, %v3516_v28 }
  0x19   : > { %3077 = vmatpush3.bf16.msra.mxu1 %v3377_v11  ;;  %v783_v11 = vld [vmem:[%s4234_s2 + $0x10] sm:$0xff] }
  0x1a   : > { %3092 = vmatprep.subr.bf16.mxu1 %v3516_v28 }
  0x1c   : > { %3079 = vmatmul.mubr.msk.bf16.vlgmr.msra.gmra.mrb[4].mxu1 %vm406_vm0, %v380_v23 }
  0x1d   : > { %3082 = vmatprep.mubr.msk.bf16.mxu1 %vm406_vm0, %v381_v24 }
  0x24   : > { %3083 = vmatmul.mubr.msk.bf16.gmra.mrb[8].mxu1 %vm406_vm0, %v382_v27 }
  0x25   : > { %3094 = vmatprep.mubr.msk.bf16.mxu1 %vm3517_vm1, %v3516_v28 }
  0xe7   : > { %v3072_v30 = vpop.f32.mrb[0].mxu1 }
  0xe8   : > { %v469_v31 = vpop.f32.mrb[1].mxu1  ;;  %v478_v33 = vadd.f32 %v3072_v30, %v2901_v29 }
  0xe9   : > { %v3073_v32 = vpop.f32.mrb[2].mxu1  ;;  %v470_v37 = vadd.f32 %v2901_v29, %v469_v31  ;;  %v785_v31 = vld [vmem:[%s4234_s2 + $0x20] sm:$0xff] }
  0xea   : > { %v481_v34 = vadd.f32 %v3073_v32, %v2901_v29  ;;  %v472_v35 = vpop.f32.mrb[3].mxu1  ;;  %v3068_v36 = vpop.f32.mrb[0].mxu0 }
  0xeb   : > { %v473_v38 = vadd.f32 %v2901_v29, %v472_v35  ;;  %v462_v39 = vadd.f32 %v3068_v36, %v2901_v29  ;;  %v453_v40 = vpop.f32.mrb[1].mxu0 }
  0xec   : > { %v3635_v41 = vpack.c.bf16 %v481_v34, %v478_v33  ;;  %v454_v42 = vadd.f32 %v2901_v29, %v453_v40  ;;  %v3069_v43 = vpop.f32.mrb[2].mxu0  ;;  %v787_v34 = vld [vmem:[%s4234_s2 + $0x30] sm:$0xff] }
  0xed   : > { %v3637_v44 = vpack.c.bf16 %v473_v38, %v470_v37  ;;  %v465_v45 = vadd.f32 %v3069_v43, %v2901_v29  ;;  %v456_v46 = vpop.f32.mrb[3].mxu0 }
  0xee   : > { %v457_v47 = vadd.f32 %v2901_v29, %v456_v46 }
  0xef   : > { %v3080_v48 = vpop.f32.mrb[4].mxu1  ;;  %v3642_v50 = vpack.c.bf16 %v465_v45, %v462_v39 }
  0xf0   : > { %v553_v51 = vpop.f32.mrb[5].mxu1  ;;  %v3644_v52 = vpack.c.bf16 %v457_v47, %v454_v42  ;;  %v562_v54 = vadd.f32 %v3080_v48, %v2908_v49  ;;  %v788_v48 = vld [vmem:[%s4234_s2 + $0x38] sm:$0xff] }
  0xf1   : > { %v3081_v53 = vpop.f32.mrb[6].mxu1  ;;  %v554_v57 = vadd.f32 %v2908_v49, %v553_v51  ;;  %v786_v51 = vld [vmem:[%s4234_s2 + $0x28] sm:$0xff] }
  0xf2   : > { %v565_v55 = vadd.f32 %v3081_v53, %v2908_v49  ;;  %v556_v56 = vpop.f32.mrb[7].mxu1 }
  0xf3   : > { %v557_v58 = vadd.f32 %v2908_v49, %v556_v56 }
  0xf4   : > { %v3646_v59 = vpack.c.bf16 %v565_v55, %v562_v54 }
  0xf5   : > { %v3648_v60 = vpack.c.bf16 %v557_v58, %v554_v57 }
  0xf6   : > { %v644_v61 = vsel %vm592_vm2, %v3646_v59, 0 }
  0xf7   : > { %v3084_v62 = vpop.f32.mrb[8].mxu1  ;;  %3093 = vmatpush3.bf16.xpose.msra.mxu1 %v644_v61  ;;  %v597_v63 = vsel %vm592_vm2, %v3648_v60, 0 }
  0xf8   : > { %v578_v0 = vadd.f32 %v3084_v62, %v2908_v49  ;;  %v569_v1 = vpop.f32.mrb[9].mxu1  ;;  %3087 = vmatpush3.bf16.xpose.msra.mxu0 %v597_v63  ;;  %3104 = vmatprep.subr.bf16.mxu1 %v3516_v28 }
  0xf9   : > { %v570_v2 = vadd.f32 %v2908_v49, %v569_v1  ;;  %v3085_v3 = vpop.f32.mrb[10].mxu1  ;;  %3098 = vmatprep.subr.bf16.mxu0 %v3516_v28 }
  0xfa   : > { %v581_v4 = vadd.f32 %v3085_v3, %v2908_v49  ;;  %v572_v5 = vpop.f32.mrb[11].mxu1 }
  0xfb   : > { %v573_v6 = vadd.f32 %v2908_v49, %v572_v5 }
  0xfc   : > { %v3656_v7 = vpack.c.bf16 %v581_v4, %v578_v0 }
  0xfd   : > { %v3658_v8 = vpack.c.bf16 %v573_v6, %v570_v2 }
  0xfe   : > { %3095 = vmatmul.mubr.msk.bf16.vlgmr.msra.gmra.mrb[12].mxu1 %vm592_vm2, %v3642_v50  ;;  %v738_v9 = vsel %vm592_vm2, %v3656_v7, 0 }
  0xff   : > { %3089 = vmatmul.mubr.msk.bf16.vlgmr.msra.gmra.mrb[4].mxu0 %vm592_vm2, %v3644_v52  ;;  %3105 = vmatpush3.bf16.xpose.msra.mxu1 %v738_v9  ;;  %v691_v10 = vsel %vm592_vm2, %v3658_v8, 0 }
 0x100   : > { %3099 = vmatpush3.bf16.xpose.msra.mxu0 %v691_v10  ;;  %3106 = vmatprep.mubr.msk.bf16.mxu1 %vm3517_vm1, %v3516_v28 }
 0x101   : > { %3100 = vmatprep.mubr.msk.bf16.mxu0 %vm3517_vm1, %v3516_v28  ;;  %3116 = vmatprep.subr.bf16.mxu1 %v3516_v28 }
 0x102   : > { %3110 = vmatprep.subr.bf16.mxu0 %v3516_v28 }
 0x106   : > { %3107 = vmatmul.mubr.msk.bf16.vlgmr.msra.gmra.mrb[16].mxu1 %vm592_vm2, %v3635_v41 }
 0x107   : > { %3101 = vmatmul.mubr.msk.bf16.vlgmr.msra.gmra.mrb[8].mxu0 %vm592_vm2, %v3637_v44  ;;  %3118 = vmatprep.mubr.msk.bf16.mxu1 %vm3517_vm1, %v3516_v28 }
 0x108   : > { %3112 = vmatprep.mubr.msk.bf16.mxu0 %vm3517_vm1, %v3516_v28 }
 0x1d1   : > { %v680_v13 = vpop.f32.mrb[12].mxu1 }
 0x1d2   : > { %v791_v15 = vadd.f32 %v783_v11, %v680_v13  ;;  %v633_v16 = vpop.f32.mrb[4].mxu0  ;;  %v3096_v17 = vpop.f32.mrb[13].mxu1 }
 0x1d3   : > { %v789_v19 = vadd.f32 %v781_v12, %v633_v16  ;;  %v3090_v20 = vpop.f32.mrb[5].mxu0  ;;  %v683_v21 = vpop.f32.mrb[14].mxu1 }
 0x1d4   : > { %v804_v22 = vsel %vm797_vm3, %v791_v15, -inf  ;;  %v792_v23 = vadd.f32 %v784_v14, %v683_v21  ;;  %v636_v24 = vpop.f32.mrb[6].mxu0  ;;  %v3097_v25 = vpop.f32.mrb[15].mxu1 }
 0x1d5   : > { %805 = vmax.xlane.f32.xlu1 %v804_v22  ;;  %v798_v26 = vsel %vm797_vm3, %v789_v19, -inf  ;;  %v790_v27 = vadd.f32 %v782_v18, %v636_v24  ;;  %v3091_v29 = vpop.f32.mrb[7].mxu0 }
 0x1d6   : > { %799 = vmax.xlane.f32.xlu0 %v798_v26  ;;  %v807_v30 = vsel %vm797_vm3, %v792_v23, -inf }
 0x1d7   : > { %v801_v33 = vsel %vm797_vm3, %v790_v27, -inf }
 0x1d9   : > { %808 = vmax.xlane.f32.xlu1 %v807_v30  ;;  %v774_v32 = vpop.f32.mrb[16].mxu1 }
 0x1da   : > { %v3108_v35 = vpop.f32.mrb[17].mxu1  ;;  %802 = vmax.xlane.f32.xlu0 %v801_v33  ;;  %v727_v36 = vpop.f32.mrb[8].mxu0  ;;  %v795_v43 = vadd.f32 %v787_v34, %v774_v32 }
 0x1db   : > { %v793_v37 = vadd.f32 %v785_v31, %v727_v36  ;;  %v3102_v38 = vpop.f32.mrb[9].mxu0  ;;  %v777_v39 = vpop.f32.mrb[18].mxu1 }
 0x1dc   : > { %v730_v40 = vpop.f32.mrb[10].mxu0  ;;  %v3109_v42 = vpop.f32.mrb[19].mxu1  ;;  %v816_v47 = vsel %vm797_vm3, %v795_v43, -inf  ;;  %v3712_v49 = vadd.f32 %v788_v48, %v777_v39 }
 0x1dd   : > { %v3103_v45 = vpop.f32.mrb[11].mxu0  ;;  %v810_v46 = vsel %vm797_vm3, %v793_v37, -inf  ;;  %v3717_v53 = vadd.f32 %v786_v51, %v730_v40 }
 0x1de   : > { %811 = vmax.xlane.f32.xlu0 %v810_v46  ;;  %v819_v54 = vsel %vm797_vm3, %v3712_v49, -inf }
 0x1df   : > { %v813_v55 = vsel %vm797_vm3, %v3717_v53, -inf }
 0x1e2   : > { %817 = vmax.xlane.f32.xlu0 %v816_v47 }
 0x1ea   : > { %939 = vrot.lane.b32.xlu1 %v3646_v59, %s3518_s24 }
 0x1ee   : > { %987 = vrot.lane.b32.xlu1 %v3658_v8, %s3518_s24 }
 0x1f8   : > { %891 = vrot.lane.b32.xlu0 %v3648_v60, %s3518_s24 }
 0x212   : > { %820 = vmax.xlane.f32.xlu1 %v819_v54 }
 0x216   : > { %814 = vmax.xlane.f32.xlu1 %v813_v55 }
 0x227   : > { %1035 = vrot.lane.b32.xlu1 %v3656_v7, %s3518_s24 }
 0x262   : > { %v806_v56 = vpop.xlane.xlu1 %805 }
 0x263   : > { %v824_v57 = vsub.f32 %v791_v15, %v806_v56  ;;  %v800_v58 = vpop.xlane.xlu0 %799 }
 0x264   : > { %v822_v61 = vsub.f32 %v789_v19, %v800_v58 }
 0x265   : > { %v834_v62 = vmul.f32 1.442695, %v824_v57 }
 0x266   : > { %v830_v63 = vmul.f32 1.442695, %v822_v61  ;;  %v809_v0 = vpop.xlane.xlu1 %808 }
 0x267   : > { %3380 = vpow2.f32 %v834_v62  ;;  %v825_v1 = vsub.f32 %v792_v23, %v809_v0  ;;  %v803_v2 = vpop.xlane.xlu0 %802 }
 0x268   : > { %v823_v3 = vsub.f32 %v790_v27, %v803_v2  ;;  %3382 = vpow2.f32 %v830_v63 }
 0x269   : > { %v836_v4 = vmul.f32 1.442695, %v825_v1 }
 0x26a   : > { %v832_v5 = vmul.f32 1.442695, %v823_v3  ;;  %v940_v6 = vpop.permute.xlu1 %939 }
 0x26b   : > { %3384 = vpow2.f32 %v836_v4  ;;  %3117 = vmatpush3.bf16.msra.mxu1 %v940_v6  ;;  %v812_v9 = vpop.xlane.xlu0 %811 }
 0x26c   : > { %3128 = vmatprep.subr.bf16.mxu1 %v3516_v28  ;;  %3386 = vpow2.f32 %v832_v5  ;;  %v826_v10 = vsub.f32 %v793_v37, %v812_v9 }
 0x26e   : > { %v838_v14 = vmul.f32 1.442695, %v826_v10  ;;  %v988_v29 = vpop.permute.xlu1 %987 }
 0x26f   : > { %v818_v11 = vpop.xlane.xlu0 %817 }
 0x270   : > { %v828_v12 = vsub.f32 %v795_v43, %v818_v11 }
 0x271   : > { %v3381_v13 = vpop.eup %3380 }
 0x272   : > { %v842_v15 = vmul.f32 1.442695, %v828_v12  ;;  %v852_v16 = vsel %vm797_vm3, %v3381_v13, 0.0  ;;  %v3383_v17 = vpop.eup %3382 }
 0x273   : > { %853 = vadd.xlane.f32.xlu0 %v852_v16  ;;  %v892_v18 = vpop.permute.xlu0 %891  ;;  %v846_v20 = vsel %vm797_vm3, %v3383_v17, 0.0 }
 0x274   : > { %3388 = vpow2.f32 %v842_v15  ;;  %3111 = vmatpush3.bf16.msra.mxu0 %v892_v18 }
 0x275   : > { %v3385_v19 = vpop.eup %3384  ;;  %3122 = vmatprep.subr.bf16.mxu0 %v3516_v28  ;;  %3390 = vpow2.f32 %v838_v14 }
 0x276   : > { %v855_v21 = vsel %vm797_vm3, %v3385_v19, 0.0  ;;  %v3387_v22 = vpop.eup %3386 }
 0x277   : > { %847 = vadd.xlane.f32.xlu0 %v846_v20  ;;  %856 = vadd.xlane.f32.xlu1 %v855_v21  ;;  %v849_v23 = vsel %vm797_vm3, %v3387_v22, 0.0 }
 0x27b   : > { %850 = vadd.xlane.f32.xlu1 %v849_v23 }
 0x27e   : > { %v3730_v24 = vpop.eup %3388 }
 0x27f   : > { %v864_v25 = vsel %vm797_vm3, %v3730_v24, 0.0  ;;  %v3734_v26 = vpop.eup %3390 }
 0x280   : > { %865 = vadd.xlane.f32.xlu0 %v864_v25  ;;  %v858_v27 = vsel %vm797_vm3, %v3734_v26, 0.0 }
 0x284   : > { %859 = vadd.xlane.f32.xlu0 %v858_v27 }
 0x28c   : > { %1137 = vrot.lane.b32.xlu1 %v3646_v59, %s3519_s29 }
 0x29a   : > { %1085 = vrot.lane.b32.xlu0 %v3648_v60, %s3519_s29 }
 0x29e   : > { %1083 = vrot.lane.b32.xlu0 %v3644_v52, %s3519_s29 }
 0x29f   : > { %v821_v30 = vpop.xlane.xlu1 %820 }
 0x2a0   : > { %v829_v31 = vsub.f32 %v3712_v49, %v821_v30 }
 0x2a2   : > { %v844_v32 = vmul.f32 1.442695, %v829_v31  ;;  %1135 = vrot.lane.b32.xlu0 %v3642_v50, %s3519_s29 }
 0x2a3   : > { %v815_v33 = vpop.xlane.xlu1 %814 }
 0x2a4   : > { %3392 = vpow2.f32 %v844_v32  ;;  %v827_v34 = vsub.f32 %v3717_v53, %v815_v33 }
 0x2a6   : > { %v840_v35 = vmul.f32 1.442695, %v827_v34  ;;  %1187 = vrot.lane.b32.xlu0 %v3637_v44, %s3519_s29 }
 0x2a7   : > { %v1036_v40 = vpop.permute.xlu1 %1035 }
 0x2a8   : > { %3394 = vpow2.f32 %v840_v35 }
 0x2ae   : > { %v3393_v36 = vpop.eup %3392 }
 0x2af   : > { %v867_v37 = vsel %vm797_vm3, %v3393_v36, 0.0 }
 0x2b0   : > { %868 = vadd.xlane.f32.xlu1 %v867_v37 }
 0x2b2   : > { %v3395_v38 = vpop.eup %3394 }
 0x2b3   : > { %v861_v39 = vsel %vm797_vm3, %v3395_v38, 0.0 }
 0x2b4   : > { %862 = vadd.xlane.f32.xlu1 %v861_v39 }
 0x2c5   : > { %1189 = vrot.lane.b32.xlu1 %v3658_v8, %s3519_s29 }
 0x2c9   : > { %1241 = vrot.lane.b32.xlu1 %v3656_v7, %s3519_s29 }
 0x2cd   : > { %1239 = vrot.lane.b32.xlu1 %v3635_v41, %s3519_s29 }
 0x300   : > { %v854_v42 = vpop.xlane.xlu0 %853 }
 0x301   : > { %3396 = vrcp.f32 %v854_v42  ;;  %v2929_v42 = vld [vmem:[%s4234_s2 + $0x50] sm:$0xff] }
 0x304   : > { %v848_v43 = vpop.xlane.xlu0 %847  ;;  %v857_v45 = vpop.xlane.xlu1 %856 }
 0x305   : > { %3398 = vrcp.f32 %v857_v45 }
 0x306   : > { %3400 = vrcp.f32 %v848_v43 }
 0x308   : > { %v851_v46 = vpop.xlane.xlu1 %850 }
 0x309   : > { %3402 = vrcp.f32 %v851_v46 }
 0x30b   : > { %v3397_v47 = vpop.eup %3396 }
 0x30c   : > { %v880_v51 = vmul.f32 %v3397_v47, %v3381_v13  ;;  %v1138_v62 = vpop.permute.xlu1 %1137 }
 0x30d   : > { %v866_v61 = vpop.xlane.xlu0 %865  ;;  %v1143_v13 = vsel %vm592_vm2, %v1138_v62, 0 }
 0x30e   : > { %3404 = vrcp.f32 %v866_v61 }
 0x30f   : > { %v3399_v48 = vpop.eup %3398 }
 0x310   : > { %v3401_v49 = vpop.eup %3400  ;;  %v881_v53 = vmul.f32 %v3399_v48, %v3385_v19 }
 0x311   : > { %v878_v56 = vmul.f32 %v3401_v49, %v3383_v17  ;;  %v860_v63 = vpop.xlane.xlu0 %859  ;;  %v2927_v49 = vld [vmem:[%s4234_s2 + $0x40] sm:$0xff] }
 0x312   : > { %v887_v55 = vpack.c.bf16 %v881_v53, %v880_v51 }
 0x313   : > { %v3403_v54 = vpop.eup %3402 }
 0x314   : > { %v879_v57 = vmul.f32 %v3403_v54, %v3387_v22  ;;  %3119 = vmatmul.mubr.msk.bf16.vlgmr.msra.gmra.mrb[20].mxu1 %vm797_vm3, %v887_v55  ;;  %v2930_v54 = vld [vmem:[%s4234_s2 + $0x58] sm:$0xff] }
 0x315   : > { %3129 = vmatpush3.bf16.msra.mxu1 %v1036_v40  ;;  %3130 = vmatprep.mubr.msk.bf16.mxu1 %vm3517_vm1, %v3516_v28  ;;  %v1086_v4 = vpop.permute.xlu0 %1085 }
 0x316   : > { %v886_v58 = vpack.c.bf16 %v879_v57, %v878_v56  ;;  %3140 = vmatprep.subr.bf16.mxu1 %v3516_v28  ;;  %v1091_v18 = vsel %vm592_vm2, %v1086_v4, 0  ;;  %v2928_v56 = vld [vmem:[%s4234_s2 + $0x48] sm:$0xff] }
 0x318   : > { %3113 = vmatmul.mubr.msk.bf16.vlgmr.msra.gmra.mrb[12].mxu0 %vm797_vm3, %v886_v58  ;;  %v3405_v2 = vpop.eup %3404 }
 0x319   : > { %3123 = vmatpush3.bf16.msra.mxu0 %v988_v29  ;;  %3124 = vmatprep.mubr.msk.bf16.mxu0 %vm3517_vm1, %v3516_v28  ;;  %v884_v5 = vmul.f32 %v3405_v2, %v3730_v24  ;;  %v1084_v16 = vpop.permute.xlu0 %1083 }
 0x31a   : > { %3134 = vmatprep.subr.bf16.mxu0 %v3516_v28 }
 0x31d   : > { %v1136_v20 = vpop.permute.xlu0 %1135 }
 0x321   : > { %v1188_v24 = vpop.permute.xlu0 %1187 }
 0x33d   : > { %v869_v0 = vpop.xlane.xlu1 %868 }
 0x33e   : > { %3406 = vrcp.f32 %v869_v0 }
 0x33f   : > { %3408 = vrcp.f32 %v860_v63 }
 0x341   : > { %v863_v1 = vpop.xlane.xlu1 %862 }
 0x342   : > { %3410 = vrcp.f32 %v863_v1 }
 0x345   : > { %v1190_v12 = vpop.permute.xlu1 %1189 }
 0x346   : > { %v1195_v22 = vsel %vm592_vm2, %v1190_v12, 0 }
 0x348   : > { %v3407_v3 = vpop.eup %3406 }
 0x349   : > { %v885_v6 = vmul.f32 %v3407_v3, %v3393_v36  ;;  %v3409_v9 = vpop.eup %3408  ;;  %v1242_v19 = vpop.permute.xlu1 %1241 }
 0x34a   : > { %v882_v14 = vmul.f32 %v3409_v9, %v3734_v26  ;;  %v1247_v21 = vsel %vm592_vm2, %v1242_v19, 0 }
 0x34b   : > { %v889_v10 = vpack.c.bf16 %v885_v6, %v884_v5  ;;  %v2931_v6 = vld [vmem:[%s4234_s2 + $0x60] sm:$0xff] }
 0x34c   : > { %v3411_v11 = vpop.eup %3410 }
 0x34d   : > { %v883_v15 = vmul.f32 %v3411_v11, %v3395_v38  ;;  %3131 = vmatmul.mubr.msk.bf16.vlgmr.msra.gmra.mrb[24].mxu1 %vm797_vm3, %v889_v10  ;;  %v1240_v23 = vpop.permute.xlu1 %1239  ;;  %v2933_v11 = vld [vmem:[%s4234_s2 + $0x70] sm:$0xff] }
 0x34e   : > { %3141 = vmatpush3.bf16.xpose.msra.mxu1 %v1143_v13  ;;  %3142 = vmatprep.mubr.msk.bf16.mxu1 %vm3517_vm1, %v3516_v28 }
 0x34f   : > { %v888_v17 = vpack.c.bf16 %v883_v15, %v882_v14  ;;  %3152 = vmatprep.subr.bf16.mxu1 %v3516_v28 }
 0x351   : > { %3125 = vmatmul.mubr.msk.bf16.vlgmr.msra.gmra.mrb[16].mxu0 %vm797_vm3, %v888_v17 }
 0x352   : > { %3135 = vmatpush3.bf16.xpose.msra.mxu0 %v1091_v18  ;;  %3136 = vmatprep.mubr.msk.bf16.mxu0 %vm3517_vm1, %v3516_v28 }
 0x353   : > { %3146 = vmatprep.subr.bf16.mxu0 %v3516_v28 }
 0x355   : > { %3143 = vmatmul.mubr.msk.bf16.vlgmr.msra.gmra.mrb[28].mxu1 %vm592_vm2, %v1136_v20  ;;  %v2934_v20 = vld [vmem:[%s4234_s2 + $0x78] sm:$0xff] }
 0x356   : > { %3153 = vmatpush3.bf16.xpose.msra.mxu1 %v1247_v21  ;;  %3154 = vmatprep.mubr.msk.bf16.mxu1 %vm3517_vm1, %v3516_v28 }
 0x357   : > { %3164 = vmatprep.subr.bf16.mxu1 %v3516_v28 }
 0x359   : > { %3137 = vmatmul.mubr.msk.bf16.vlgmr.msra.gmra.mrb[20].mxu0 %vm592_vm2, %v1084_v16 }
 0x35a   : > { %3147 = vmatpush3.bf16.xpose.msra.mxu0 %v1195_v22  ;;  %3148 = vmatprep.mubr.msk.bf16.mxu0 %vm3517_vm1, %v3516_v28  ;;  %v2932_v22 = vld [vmem:[%s4234_s2 + $0x68] sm:$0xff] }
 0x35b   : > { %3158 = vmatprep.subr.bf16.mxu0 %v3516_v28 }
 0x35d   : > { %3155 = vmatmul.mubr.msk.bf16.vlgmr.msra.gmra.mrb[32].mxu1 %vm592_vm2, %v1240_v23 }
 0x35e   : > { %3166 = vmatprep.mubr.msk.bf16.mxu1 %vm3517_vm1, %v3516_v28 }
 0x361   : > { %3149 = vmatmul.mubr.msk.bf16.vlgmr.msra.gmra.mrb[24].mxu0 %vm592_vm2, %v1188_v24 }
 0x362   : > { %3160 = vmatprep.mubr.msk.bf16.mxu0 %vm3517_vm1, %v3516_v28 }
 0x3e7   : > { %v3786_v25 = vpop.f32.mrb[20].mxu1 }
 0x3e8   : > { %v3120_v26 = vpop.f32.mrb[21].mxu1 }
 0x3e9   : > { %v3788_v27 = vpop.f32.mrb[22].mxu1 }
 0x3ea   : > { %v3121_v29 = vpop.f32.mrb[23].mxu1 }
 0x3eb   : > { %v3790_v30 = vpop.f32.mrb[12].mxu0 }
 0x3ec   : > { %v3114_v31 = vpop.f32.mrb[13].mxu0 }
 0x3ed   : > { %v3792_v32 = vpop.f32.mrb[14].mxu0 }
 0x3ee   : > { %v3115_v33 = vpop.f32.mrb[15].mxu0 }
 0x420   : > { %v3794_v34 = vpop.f32.mrb[24].mxu1 }
 0x421   : > { %v3132_v35 = vpop.f32.mrb[25].mxu1 }
 0x422   : > { %v3796_v36 = vpop.f32.mrb[26].mxu1 }
 0x423   : > { %v3133_v37 = vpop.f32.mrb[27].mxu1 }
 0x424   : > { %v3798_v38 = vpop.f32.mrb[16].mxu0 }
 0x425   : > { %v3126_v39 = vpop.f32.mrb[17].mxu0 }
 0x426   : > { %v3800_v40 = vpop.f32.mrb[18].mxu0 }
 0x427   : > { %v3127_v43 = vpop.f32.mrb[19].mxu0 }
 0x428   : > { %v1179_v45 = vpop.f32.mrb[28].mxu1 }
 0x429   : > { %v1301_v46 = vadd.f32 %v2929_v42, %v1179_v45  ;;  %v3144_v47 = vpop.f32.mrb[29].mxu1 }
 0x42a   : > { %v1182_v48 = vpop.f32.mrb[30].mxu1 }
 0x42b   : > { %v3145_v51 = vpop.f32.mrb[31].mxu1  ;;  %v1313_v53 = vsel %vm797_vm3, %v1301_v46, -inf  ;;  %v1302_v62 = vadd.f32 %v2930_v54, %v1182_v48 }
 0x42c   : > { %1314 = vmax.xlane.f32.xlu0 %v1313_v53  ;;  %v1127_v55 = vpop.f32.mrb[20].mxu0 }
 0x42d   : > { %v1299_v57 = vadd.f32 %v2927_v49, %v1127_v55  ;;  %v3138_v58 = vpop.f32.mrb[21].mxu0  ;;  %v1316_v10 = vsel %vm797_vm3, %v1302_v62, -inf }
 0x42e   : > { %v1130_v61 = vpop.f32.mrb[22].mxu0 }
 0x42f   : > { %v1300_v63 = vadd.f32 %v2928_v56, %v1130_v61  ;;  %v3139_v0 = vpop.f32.mrb[23].mxu0  ;;  %v1307_v1 = vsel %vm797_vm3, %v1299_v57, -inf }
 0x430   : > { %v1283_v2 = vpop.f32.mrb[32].mxu1  ;;  %1308 = vmax.xlane.f32.xlu0 %v1307_v1 }
 0x431   : > { %v3156_v3 = vpop.f32.mrb[33].mxu1  ;;  %v1310_v4 = vsel %vm797_vm3, %v1300_v63, -inf  ;;  %v1305_v16 = vadd.f32 %v2933_v11, %v1283_v2 }
 0x432   : > { %v1286_v5 = vpop.f32.mrb[34].mxu1  ;;  %1311 = vmax.xlane.f32.xlu1 %v1310_v4 }
 0x433   : > { %v3157_v9 = vpop.f32.mrb[35].mxu1  ;;  %v1325_v19 = vsel %vm797_vm3, %v1305_v16, -inf  ;;  %v3832_v21 = vadd.f32 %v2934_v20, %v1286_v5 }
 0x434   : > { %1317 = vmax.xlane.f32.xlu0 %v1316_v10  ;;  %v1231_v12 = vpop.f32.mrb[24].mxu0 }
 0x435   : > { %v1303_v13 = vadd.f32 %v2931_v6, %v1231_v12  ;;  %v3150_v14 = vpop.f32.mrb[25].mxu0  ;;  %v1328_v24 = vsel %vm797_vm3, %v3832_v21, -inf }
 0x436   : > { %v1234_v15 = vpop.f32.mrb[26].mxu0 }
 0x437   : > { %v3151_v17 = vpop.f32.mrb[27].mxu0  ;;  %v1319_v18 = vsel %vm797_vm3, %v1303_v13, -inf  ;;  %v3837_v23 = vadd.f32 %v2932_v22, %v1234_v15 }
 0x438   : > { %1320 = vmax.xlane.f32.xlu0 %v1319_v18 }
 0x439   : > { %v1322_v26 = vsel %vm797_vm3, %v3837_v23, -inf }
 0x43c   : > { %1326 = vmax.xlane.f32.xlu0 %v1325_v19 }
 0x443   : > { %1446 = vrot.lane.b32.xlu1 %v3646_v59, %s3520_s23 }
 0x447   : > { %1493 = vrot.lane.b32.xlu1 %v3658_v8, %s3520_s23 }
 0x452   : > { %1399 = vrot.lane.b32.xlu0 %v3648_v60, %s3520_s23 }
 0x46b   : > { %1329 = vmax.xlane.f32.xlu1 %v1328_v24 }
 0x46f   : > { %1323 = vmax.xlane.f32.xlu1 %v1322_v26 }
 0x480   : > { %1540 = vrot.lane.b32.xlu1 %v3656_v7, %s3520_s23 }
 0x4b9   : > { %v1315_v29 = vpop.xlane.xlu0 %1314 }
 0x4ba   : > { %v1333_v31 = vsub.f32 %v1301_v46, %v1315_v29 }
 0x4bc   : > { %v1343_v33 = vmul.f32 1.442695, %v1333_v31 }
 0x4bd   : > { %v1309_v35 = vpop.xlane.xlu0 %1308 }
 0x4be   : > { %3412 = vpow2.f32 %v1343_v33  ;;  %v1331_v37 = vsub.f32 %v1299_v57, %v1309_v35 }
 0x4bf   : > { %v1312_v39 = vpop.xlane.xlu1 %1311 }
 0x4c0   : > { %v1339_v42 = vmul.f32 1.442695, %v1331_v37  ;;  %v1332_v43 = vsub.f32 %v1300_v63, %v1312_v39 }
 0x4c1   : > { %v1318_v45 = vpop.xlane.xlu0 %1317 }
 0x4c2   : > { %3414 = vpow2.f32 %v1339_v42  ;;  %v1334_v47 = vsub.f32 %v1302_v62, %v1318_v45  ;;  %v1341_v49 = vmul.f32 1.442695, %v1332_v43 }
 0x4c3   : > { %v1447_v48 = vpop.permute.xlu1 %1446 }
 0x4c4   : > { %v1345_v51 = vmul.f32 1.442695, %v1334_v47  ;;  %3165 = vmatpush3.bf16.msra.mxu1 %v1447_v48 }
 0x4c5   : > { %v1321_v53 = vpop.xlane.xlu0 %1320  ;;  %3176 = vmatprep.subr.bf16.mxu1 %v3516_v28 }
 0x4c6   : > { %3416 = vpow2.f32 %v1345_v51  ;;  %v1335_v46 = vsub.f32 %v1303_v13, %v1321_v53 }
 0x4c7   : > { %3418 = vpow2.f32 %v1341_v49  ;;  %v1494_v11 = vpop.permute.xlu1 %1493 }
 0x4c8   : > { %v3845_v54 = vpop.eup %3412  ;;  %v1347_v61 = vmul.f32 1.442695, %v1335_v46 }
 0x4c9   : > { %v1327_v55 = vpop.xlane.xlu0 %1326  ;;  %v1361_v56 = vsel %vm797_vm3, %v3845_v54, 0.0 }
 0x4ca   : > { %v1337_v57 = vsub.f32 %v1305_v16, %v1327_v55  ;;  %1362 = vadd.xlane.f32.xlu0 %v1361_v56 }
 0x4cc   : > { %v3415_v58 = vpop.eup %3414  ;;  %v1351_v62 = vmul.f32 1.442695, %v1337_v57 }
 0x4cd   : > { %v1400_v63 = vpop.permute.xlu0 %1399  ;;  %v1355_v0 = vsel %vm797_vm3, %v3415_v58, 0.0 }
 0x4ce   : > { %3420 = vpow2.f32 %v1351_v62  ;;  %1356 = vadd.xlane.f32.xlu0 %v1355_v0  ;;  %3159 = vmatpush3.bf16.msra.mxu0 %v1400_v63 }
 0x4cf   : > { %3170 = vmatprep.subr.bf16.mxu0 %v3516_v28  ;;  %3422 = vpow2.f32 %v1347_v61 }
 0x4d0   : > { %v3417_v1 = vpop.eup %3416 }
 0x4d1   : > { %v1364_v2 = vsel %vm797_vm3, %v3417_v1, 0.0  ;;  %v3419_v3 = vpop.eup %3418 }
 0x4d2   : > { %1365 = vadd.xlane.f32.xlu1 %v1364_v2  ;;  %v1358_v4 = vsel %vm797_vm3, %v3419_v3, 0.0 }
 0x4d6   : > { %1359 = vadd.xlane.f32.xlu1 %v1358_v4 }
 0x4d8   : > { %v3853_v5 = vpop.eup %3420 }
 0x4d9   : > { %v1373_v6 = vsel %vm797_vm3, %v3853_v5, 0.0  ;;  %v3857_v9 = vpop.eup %3422 }
 0x4da   : > { %1374 = vadd.xlane.f32.xlu0 %v1373_v6  ;;  %v1367_v10 = vsel %vm797_vm3, %v3857_v9, 0.0 }
 0x4de   : > { %1368 = vadd.xlane.f32.xlu0 %v1367_v10 }
 0x4e7   : > { %1640 = vrot.lane.b32.xlu1 %v3646_v59, %s3521_s28 }
 0x4f4   : > { %1589 = vrot.lane.b32.xlu0 %v3648_v60, %s3521_s28 }
 0x4f8   : > { %v1330_v12 = vpop.xlane.xlu1 %1329  ;;  %1587 = vrot.lane.b32.xlu0 %v3644_v52, %s3521_s28 }
 0x4f9   : > { %v1338_v13 = vsub.f32 %v3832_v21, %v1330_v12 }
 0x4fb   : > { %v1353_v14 = vmul.f32 1.442695, %v1338_v13 }
 0x4fc   : > { %1638 = vrot.lane.b32.xlu0 %v3642_v50, %s3521_s28  ;;  %v1324_v15 = vpop.xlane.xlu1 %1323 }
 0x4fd   : > { %3424 = vpow2.f32 %v1353_v14  ;;  %v1336_v16 = vsub.f32 %v3837_v23, %v1324_v15 }
 0x4ff   : > { %v1349_v17 = vmul.f32 1.442695, %v1336_v16 }
 0x500   : > { %1689 = vrot.lane.b32.xlu0 %v3637_v44, %s3521_s28  ;;  %v1541_v23 = vpop.permute.xlu1 %1540 }
 0x501   : > { %3426 = vpow2.f32 %v1349_v17 }
 0x507   : > { %v3425_v18 = vpop.eup %3424 }
 0x508   : > { %v1376_v19 = vsel %vm797_vm3, %v3425_v18, 0.0 }
 0x50b   : > { %v3427_v20 = vpop.eup %3426  ;;  %1377 = vadd.xlane.f32.xlu1 %v1376_v19 }
 0x50c   : > { %v1370_v22 = vsel %vm797_vm3, %v3427_v20, 0.0 }
 0x50f   : > { %1371 = vadd.xlane.f32.xlu1 %v1370_v22 }
 0x520   : > { %1691 = vrot.lane.b32.xlu1 %v3658_v8, %s3521_s28 }
 0x524   : > { %1742 = vrot.lane.b32.xlu1 %v3656_v7, %s3521_s28 }
 0x528   : > { %1740 = vrot.lane.b32.xlu1 %v3635_v41, %s3521_s28 }
 0x557   : > { %v1363_v21 = vpop.xlane.xlu0 %1362 }
 0x558   : > { %3428 = vrcp.f32 %v1363_v21 }
 0x55b   : > { %v1357_v24 = vpop.xlane.xlu0 %1356 }
 0x55f   : > { %v1366_v26 = vpop.xlane.xlu1 %1365 }
 0x560   : > { %3430 = vrcp.f32 %v1366_v26 }
 0x561   : > { %3432 = vrcp.f32 %v1357_v24 }
 0x562   : > { %v3429_v31 = vpop.eup %3428 }
 0x563   : > { %v1360_v29 = vpop.xlane.xlu1 %1359  ;;  %v1389_v35 = vmul.f32 %v3429_v31, %v3845_v54 }
 0x564   : > { %3434 = vrcp.f32 %v1360_v29 }
 0x567   : > { %v1375_v49 = vpop.xlane.xlu0 %1374  ;;  %v1641_v51 = vpop.permute.xlu1 %1640 }
 0x568   : > { %3436 = vrcp.f32 %v1375_v49  ;;  %v1646_v2 = vsel %vm592_vm2, %v1641_v51, 0 }
 0x56a   : > { %v3431_v33 = vpop.eup %3430 }
 0x56b   : > { %v1390_v37 = vmul.f32 %v3431_v33, %v3417_v1  ;;  %v3433_v39 = vpop.eup %3432  ;;  %v1369_v53 = vpop.xlane.xlu0 %1368 }
 0x56c   : > { %v1387_v45 = vmul.f32 %v3433_v39, %v3415_v58 }
 0x56d   : > { %v1396_v42 = vpack.c.bf16 %v1390_v37, %v1389_v35 }
 0x56e   : > { %v3435_v43 = vpop.eup %3434 }
 0x56f   : > { %v1388_v47 = vmul.f32 %v3435_v43, %v3419_v3  ;;  %3167 = vmatmul.mubr.msk.bf16.vlgmr.msra.gmra.mrb[36].mxu1 %vm797_vm3, %v1396_v42  ;;  %v1590_v57 = vpop.permute.xlu0 %1589 }
 0x570   : > { %3177 = vmatpush3.bf16.msra.mxu1 %v1541_v23  ;;  %3178 = vmatprep.mubr.msk.bf16.mxu1 %vm3517_vm1, %v3516_v28 }
 0x571   : > { %v1395_v48 = vpack.c.bf16 %v1388_v47, %v1387_v45  ;;  %3188 = vmatprep.subr.bf16.mxu1 %v3516_v28  ;;  %v2945_v45 = vld [vmem:[%s4234_s2 + $0x90] sm:$0xff] }
 0x572   : > { %v3437_v55 = vpop.eup %3436 }
 0x573   : > { %3161 = vmatmul.mubr.msk.bf16.vlgmr.msra.gmra.mrb[28].mxu0 %vm797_vm3, %v1395_v48  ;;  %v1393_v58 = vmul.f32 %v3437_v55, %v3853_v5  ;;  %v1588_v6 = vpop.permute.xlu0 %1587  ;;  %v1595_v5 = vsel %vm592_vm2, %v1590_v57, 0  ;;  %v2946_v57 = vld [vmem:[%s4234_s2 + $0x98] sm:$0xff] }
 0x574   : > { %3171 = vmatpush3.bf16.msra.mxu0 %v1494_v11  ;;  %3172 = vmatprep.mubr.msk.bf16.mxu0 %vm3517_vm1, %v3516_v28 }
 0x575   : > { %3182 = vmatprep.subr.bf16.mxu0 %v3516_v28 }
 0x598   : > { %v1378_v54 = vpop.xlane.xlu1 %1377 }
 0x599   : > { %3438 = vrcp.f32 %v1378_v54 }
 0x59a   : > { %3440 = vrcp.f32 %v1369_v53 }
 0x59c   : > { %v1372_v46 = vpop.xlane.xlu1 %1371 }
 0x59d   : > { %3442 = vrcp.f32 %v1372_v46  ;;  %v2943_v46 = vld [vmem:[%s4234_s2 + $0x80] sm:$0xff] }
 0x5a0   : > { %v1692_v1 = vpop.permute.xlu1 %1691 }
 0x5a1   : > { %v1697_v13 = vsel %vm592_vm2, %v1692_v1, 0 }
 0x5a3   : > { %v3439_v56 = vpop.eup %3438 }
 0x5a4   : > { %v1394_v61 = vmul.f32 %v3439_v56, %v3425_v18  ;;  %v3441_v62 = vpop.eup %3440  ;;  %v1743_v11 = vpop.permute.xlu1 %1742 }
 0x5a5   : > { %v1391_v3 = vmul.f32 %v3441_v62, %v3857_v9  ;;  %v1639_v9 = vpop.permute.xlu0 %1638  ;;  %v1748_v12 = vsel %vm592_vm2, %v1743_v11, 0 }
 0x5a6   : > { %v1398_v63 = vpack.c.bf16 %v1394_v61, %v1393_v58  ;;  %v2944_v61 = vld [vmem:[%s4234_s2 + $0x88] sm:$0xff] }
 0x5a7   : > { %v3443_v0 = vpop.eup %3442 }
 0x5a8   : > { %v1392_v4 = vmul.f32 %v3443_v0, %v3427_v20  ;;  %3179 = vmatmul.mubr.msk.bf16.vlgmr.msra.gmra.mrb[40].mxu1 %vm797_vm3, %v1398_v63  ;;  %v1741_v14 = vpop.permute.xlu1 %1740 }
 0x5a9   : > { %3189 = vmatpush3.bf16.xpose.msra.mxu1 %v1646_v2  ;;  %3190 = vmatprep.mubr.msk.bf16.mxu1 %vm3517_vm1, %v3516_v28  ;;  %v1690_v15 = vpop.permute.xlu0 %1689 }
 0x5aa   : > { %v1397_v10 = vpack.c.bf16 %v1392_v4, %v1391_v3  ;;  %3200 = vmatprep.subr.bf16.mxu1 %v3516_v28 }
 0x5ac   : > { %3173 = vmatmul.mubr.msk.bf16.vlgmr.msra.gmra.mrb[32].mxu0 %vm797_vm3, %v1397_v10 }
 0x5ad   : > { %3183 = vmatpush3.bf16.xpose.msra.mxu0 %v1595_v5  ;;  %3184 = vmatprep.mubr.msk.bf16.mxu0 %vm3517_vm1, %v3516_v28 }
 0x5ae   : > { %3194 = vmatprep.subr.bf16.mxu0 %v3516_v28 }
 0x5b0   : > { %3191 = vmatmul.mubr.msk.bf16.vlgmr.msra.gmra.mrb[44].mxu1 %vm592_vm2, %v1639_v9  ;;  %v2947_v9 = vld [vmem:[%s4234_s2 + $0xa0] sm:$0xff] }
 0x5b1   : > { %3201 = vmatpush3.bf16.xpose.msra.mxu1 %v1748_v12  ;;  %3202 = vmatprep.mubr.msk.bf16.mxu1 %vm3517_vm1, %v3516_v28 }
 0x5b2   : > { %3212 = vmatprep.subr.bf16.mxu1 %v3516_v28 }
 0x5b4   : > { %3185 = vmatmul.mubr.msk.bf16.vlgmr.msra.gmra.mrb[36].mxu0 %vm592_vm2, %v1588_v6 }
 0x5b5   : > { %3195 = vmatpush3.bf16.xpose.msra.mxu0 %v1697_v13  ;;  %3196 = vmatprep.mubr.msk.bf16.mxu0 %vm3517_vm1, %v3516_v28 }
 0x5b6   : > { %3206 = vmatprep.subr.bf16.mxu0 %v3516_v28 }
 0x5b8   : > { %3203 = vmatmul.mubr.msk.bf16.vlgmr.msra.gmra.mrb[48].mxu1 %vm592_vm2, %v1741_v14  ;;  %v2949_v14 = vld [vmem:[%s4234_s2 + $0xb0] sm:$0xff] }
 0x5b9   : > { %3214 = vmatprep.mubr.msk.bf16.mxu1 %vm3517_vm1, %v3516_v28 }
 0x5bc   : > { %3197 = vmatmul.mubr.msk.bf16.vlgmr.msra.gmra.mrb[40].mxu0 %vm592_vm2, %v1690_v15 }
 0x5bd   : > { %3208 = vmatprep.mubr.msk.bf16.mxu0 %vm3517_vm1, %v3516_v28 }
 0x642   : > { %v3910_v16 = vpop.f32.mrb[36].mxu1 }
 0x643   : > { %v3168_v17 = vpop.f32.mrb[37].mxu1 }
 0x644   : > { %v3912_v18 = vpop.f32.mrb[38].mxu1 }
 0x645   : > { %v3319_v19 = vpack.i.bf16 %v3912_v18, %v3910_v16  ;;  %v3169_v20 = vpop.f32.mrb[39].mxu1 }
 0x646   : > { %v3916_v22 = vpop.f32.mrb[28].mxu0 }
 0x647   : > { %v3162_v21 = vpop.f32.mrb[29].mxu0 }
 0x648   : > { %v3918_v23 = vpop.f32.mrb[30].mxu0 }
 0x649   : > { %v3314_v24 = vpack.i.bf16 %v3918_v23, %v3916_v22  ;;  %v3163_v26 = vpop.f32.mrb[31].mxu0 }
 0x67b   : > { %v3922_v29 = vpop.f32.mrb[40].mxu1 }
 0x67c   : > { %v3180_v31 = vpop.f32.mrb[41].mxu1 }
 0x67d   : > { %v3924_v33 = vpop.f32.mrb[42].mxu1 }
 0x67e   : > { %v3339_v35 = vpack.i.bf16 %v3924_v33, %v3922_v29  ;;  %v3181_v37 = vpop.f32.mrb[43].mxu1 }
 0x67f   : > { %v3928_v39 = vpop.f32.mrb[32].mxu0 }
 0x680   : > { %v3174_v42 = vpop.f32.mrb[33].mxu0 }
 0x681   : > { %v3930_v43 = vpop.f32.mrb[34].mxu0 }
 0x682   : > { %v3334_v47 = vpack.i.bf16 %v3930_v43, %v3928_v39  ;;  %v3175_v48 = vpop.f32.mrb[35].mxu0 }
 0x683   : > { %v1682_v49 = vpop.f32.mrb[44].mxu1 }
 0x684   : > { %v1802_v51 = vadd.f32 %v2945_v45, %v1682_v49  ;;  %v3192_v53 = vpop.f32.mrb[45].mxu1  ;;  %v2950_v45 = vld [vmem:[%s4234_s2 + $0xb8] sm:$0xff]  ;;  %v2948_v49 = vld [vmem:[%s4234_s2 + $0xa8] sm:$0xff] }
 0x685   : > { %v1685_v54 = vpop.f32.mrb[46].mxu1 }
 0x686   : > { %v3193_v55 = vpop.f32.mrb[47].mxu1  ;;  %v1814_v56 = vsel %vm797_vm3, %v1802_v51, -inf  ;;  %v1803_v1 = vadd.f32 %v2946_v57, %v1685_v54 }
 0x687   : > { %1815 = vmax.xlane.f32.xlu0 %v1814_v56  ;;  %v1631_v58 = vpop.f32.mrb[36].mxu0 }
 0x688   : > { %v1800_v62 = vadd.f32 %v2943_v46, %v1631_v58  ;;  %v3186_v63 = vpop.f32.mrb[37].mxu0  ;;  %v1817_v13 = vsel %vm797_vm3, %v1803_v1, -inf }
 0x689   : > { %v1634_v0 = vpop.f32.mrb[38].mxu0 }
 0x68a   : > { %v1801_v2 = vadd.f32 %v2944_v61, %v1634_v0  ;;  %v3187_v3 = vpop.f32.mrb[39].mxu0  ;;  %v1808_v4 = vsel %vm797_vm3, %v1800_v62, -inf }
 0x68b   : > { %v1784_v6 = vpop.f32.mrb[48].mxu1  ;;  %1809 = vmax.xlane.f32.xlu0 %v1808_v4 }
 0x68c   : > { %v3204_v10 = vpop.f32.mrb[49].mxu1  ;;  %v1811_v5 = vsel %vm797_vm3, %v1801_v2, -inf  ;;  %v1806_v26 = vadd.f32 %v2949_v14, %v1784_v6 }
 0x68d   : > { %v1787_v11 = vpop.f32.mrb[50].mxu1  ;;  %1812 = vmax.xlane.f32.xlu1 %v1811_v5 }
 0x68e   : > { %v3205_v12 = vpop.f32.mrb[51].mxu1  ;;  %v1826_v42 = vsel %vm797_vm3, %v1806_v26, -inf  ;;  %v3964_v48 = vadd.f32 %v2950_v45, %v1787_v11 }
 0x68f   : > { %1818 = vmax.xlane.f32.xlu0 %v1817_v13  ;;  %v1733_v15 = vpop.f32.mrb[40].mxu0 }
 0x690   : > { %v1804_v17 = vadd.f32 %v2947_v9, %v1733_v15  ;;  %v3198_v20 = vpop.f32.mrb[41].mxu0  ;;  %v1829_v54 = vsel %vm797_vm3, %v3964_v48, -inf }
 0x691   : > { %v1736_v21 = vpop.f32.mrb[42].mxu0 }
 0x692   : > { %v3199_v31 = vpop.f32.mrb[43].mxu0  ;;  %v1820_v37 = vsel %vm797_vm3, %v1804_v17, -inf  ;;  %v3969_v53 = vadd.f32 %v2948_v49, %v1736_v21 }
 0x693   : > { %1821 = vmax.xlane.f32.xlu0 %v1820_v37 }
 0x694   : > { %v1823_v46 = vsel %vm797_vm3, %v3969_v53, -inf }
 0x697   : > { %1827 = vmax.xlane.f32.xlu0 %v1826_v42 }
 0x69e   : > { %1947 = vrot.lane.b32.xlu1 %v3646_v59, %s3522_s22 }
 0x6a2   : > { %1994 = vrot.lane.b32.xlu1 %v3658_v8, %s3522_s22 }
 0x6ad   : > { %1900 = vrot.lane.b32.xlu0 %v3648_v60, %s3522_s22 }
 0x6c6   : > { %1830 = vmax.xlane.f32.xlu1 %v1829_v54 }
 0x6ca   : > { %1824 = vmax.xlane.f32.xlu1 %v1823_v46 }
 0x6db   : > { %2041 = vrot.lane.b32.xlu1 %v3656_v7, %s3522_s22 }
 0x714   : > { %v1816_v55 = vpop.xlane.xlu0 %1815 }
 0x715   : > { %v1834_v56 = vsub.f32 %v1802_v51, %v1816_v55 }
 0x717   : > { %v1844_v57 = vmul.f32 1.442695, %v1834_v56 }
 0x718   : > { %v1810_v58 = vpop.xlane.xlu0 %1809 }
 0x719   : > { %3444 = vpow2.f32 %v1844_v57  ;;  %v1832_v61 = vsub.f32 %v1800_v62, %v1810_v58 }
 0x71a   : > { %v1813_v63 = vpop.xlane.xlu1 %1812 }
 0x71b   : > { %v1840_v0 = vmul.f32 1.442695, %v1832_v61  ;;  %v1833_v3 = vsub.f32 %v1801_v2, %v1813_v63 }
 0x71c   : > { %v1819_v4 = vpop.xlane.xlu0 %1818 }
 0x71d   : > { %3446 = vpow2.f32 %v1840_v0  ;;  %v1835_v6 = vsub.f32 %v1803_v1, %v1819_v4  ;;  %v1842_v5 = vmul.f32 1.442695, %v1833_v3 }
 0x71e   : > { %v1948_v10 = vpop.permute.xlu1 %1947 }
 0x71f   : > { %v1846_v11 = vmul.f32 1.442695, %v1835_v6  ;;  %3213 = vmatpush3.bf16.msra.mxu1 %v1948_v10 }
 0x720   : > { %v1822_v9 = vpop.xlane.xlu0 %1821  ;;  %3224 = vmatprep.subr.bf16.mxu1 %v3516_v28 }
 0x721   : > { %3448 = vpow2.f32 %v1846_v11  ;;  %v1836_v51 = vsub.f32 %v1804_v17, %v1822_v9 }
 0x722   : > { %3450 = vpow2.f32 %v1842_v5  ;;  %v1995_v46 = vpop.permute.xlu1 %1994 }
 0x723   : > { %v3977_v12 = vpop.eup %3444  ;;  %v1848_v1 = vmul.f32 1.442695, %v1836_v51 }
 0x724   : > { %v1828_v13 = vpop.xlane.xlu0 %1827  ;;  %v1862_v62 = vsel %vm797_vm3, %v3977_v12, 0.0 }
 0x725   : > { %v1838_v2 = vsub.f32 %v1806_v26, %v1828_v13  ;;  %1863 = vadd.xlane.f32.xlu0 %v1862_v62 }
 0x727   : > { %v3447_v14 = vpop.eup %3446  ;;  %v1852_v15 = vmul.f32 1.442695, %v1838_v2 }
 0x728   : > { %v1901_v20 = vpop.permute.xlu0 %1900  ;;  %v1856_v21 = vsel %vm797_vm3, %v3447_v14, 0.0 }
 0x729   : > { %3452 = vpow2.f32 %v1852_v15  ;;  %1857 = vadd.xlane.f32.xlu0 %v1856_v21  ;;  %3207 = vmatpush3.bf16.msra.mxu0 %v1901_v20 }
 0x72a   : > { %3218 = vmatprep.subr.bf16.mxu0 %v3516_v28  ;;  %3454 = vpow2.f32 %v1848_v1 }
 0x72b   : > { %v3449_v31 = vpop.eup %3448 }
 0x72c   : > { %v1865_v17 = vsel %vm797_vm3, %v3449_v31, 0.0  ;;  %v3451_v37 = vpop.eup %3450 }
 0x72d   : > { %1866 = vadd.xlane.f32.xlu1 %v1865_v17  ;;  %v1859_v26 = vsel %vm797_vm3, %v3451_v37, 0.0 }
 0x731   : > { %1860 = vadd.xlane.f32.xlu1 %v1859_v26 }
 0x733   : > { %v3985_v42 = vpop.eup %3452 }
 0x734   : > { %v1874_v45 = vsel %vm797_vm3, %v3985_v42, 0.0  ;;  %v3989_v49 = vpop.eup %3454 }
 0x735   : > { %1875 = vadd.xlane.f32.xlu0 %v1874_v45  ;;  %v1868_v54 = vsel %vm797_vm3, %v3989_v49, 0.0 }
 0x739   : > { %1869 = vadd.xlane.f32.xlu0 %v1868_v54 }
 0x742   : > { %2141 = vrot.lane.b32.xlu1 %v3646_v59, %s3523_s27 }
 0x74f   : > { %2090 = vrot.lane.b32.xlu0 %v3648_v60, %s3523_s27 }
 0x753   : > { %v1831_v55 = vpop.xlane.xlu1 %1830  ;;  %2088 = vrot.lane.b32.xlu0 %v3644_v52, %s3523_s27 }
 0x754   : > { %v1839_v56 = vsub.f32 %v3964_v48, %v1831_v55 }
 0x756   : > { %v1854_v57 = vmul.f32 1.442695, %v1839_v56 }
 0x757   : > { %2139 = vrot.lane.b32.xlu0 %v3642_v50, %s3523_s27  ;;  %v1825_v58 = vpop.xlane.xlu1 %1824 }
 0x758   : > { %3456 = vpow2.f32 %v1854_v57  ;;  %v1837_v61 = vsub.f32 %v3969_v53, %v1825_v58 }
 0x75a   : > { %v1850_v63 = vmul.f32 1.442695, %v1837_v61 }
 0x75b   : > { %2190 = vrot.lane.b32.xlu0 %v3637_v44, %s3523_s27  ;;  %v2042_v48 = vpop.permute.xlu1 %2041 }
 0x75c   : > { %3458 = vpow2.f32 %v1850_v63 }
 0x762   : > { %v3457_v0 = vpop.eup %3456 }
 0x763   : > { %v1877_v3 = vsel %vm797_vm3, %v3457_v0, 0.0 }
 0x766   : > { %v3459_v4 = vpop.eup %3458  ;;  %1878 = vadd.xlane.f32.xlu1 %v1877_v3 }
 0x767   : > { %v1871_v52 = vsel %vm797_vm3, %v3459_v4, 0.0 }
 0x76a   : > { %1872 = vadd.xlane.f32.xlu1 %v1871_v52 }
 0x77b   : > { %2192 = vrot.lane.b32.xlu1 %v3658_v8, %s3523_s27 }
 0x77f   : > { %2243 = vrot.lane.b32.xlu1 %v3656_v7, %s3523_s27 }
 0x783   : > { %2241 = vrot.lane.b32.xlu1 %v3635_v41, %s3523_s27  ;;  %s3526_s27 = smov 16  }
 0x7b2   : > { %v1864_v50 = vpop.xlane.xlu0 %1863 }
 0x7b3   : > { %3460 = vrcp.f32 %v1864_v50 }
 0x7b6   : > { %v1858_v53 = vpop.xlane.xlu0 %1857 }
 0x7ba   : > { %v1867_v44 = vpop.xlane.xlu1 %1866 }
 0x7bb   : > { %3462 = vrcp.f32 %v1867_v44 }
 0x7bc   : > { %3464 = vrcp.f32 %v1858_v53 }
 0x7bd   : > { %v3461_v10 = vpop.eup %3460 }
 0x7be   : > { %v1861_v6 = vpop.xlane.xlu1 %1860  ;;  %v1890_v11 = vmul.f32 %v3461_v10, %v3977_v12 }
 0x7bf   : > { %3466 = vrcp.f32 %v1861_v6 }
 0x7c2   : > { %v1876_v12 = vpop.xlane.xlu0 %1875 }
 0x7c3   : > { %3468 = vrcp.f32 %v1876_v12 }
 0x7c5   : > { %v3463_v5 = vpop.eup %3462 }
 0x7c6   : > { %v1891_v9 = vmul.f32 %v3463_v5, %v3449_v31  ;;  %v3465_v51 = vpop.eup %3464  ;;  %v1870_v15 = vpop.xlane.xlu0 %1869 }
 0x7c7   : > { %v1888_v2 = vmul.f32 %v3465_v51, %v3447_v14  ;;  %v2142_v14 = vpop.permute.xlu1 %2141 }
 0x7c8   : > { %v1897_v13 = vpack.c.bf16 %v1891_v9, %v1890_v11  ;;  %v2147_v57 = vsel %vm592_vm2, %v2142_v14, 0 }
 0x7c9   : > { %v3467_v62 = vpop.eup %3466 }
 0x7ca   : > { %v1889_v1 = vmul.f32 %v3467_v62, %v3451_v37  ;;  %3215 = vmatmul.mubr.msk.bf16.vlgmr.msra.gmra.mrb[52].mxu1 %vm797_vm3, %v1897_v13  ;;  %v2091_v37 = vpop.permute.xlu0 %2090 }
 0x7cb   : > { %3225 = vmatpush3.bf16.msra.mxu1 %v2042_v48  ;;  %3226 = vmatprep.mubr.msk.bf16.mxu1 %vm3517_vm1, %v3516_v28 }
 0x7cc   : > { %v1896_v41 = vpack.c.bf16 %v1889_v1, %v1888_v2  ;;  %3236 = vmatprep.subr.bf16.mxu1 %v3516_v28 }
 0x7cd   : > { %v3469_v31 = vpop.eup %3468 }
 0x7ce   : > { %3209 = vmatmul.mubr.msk.bf16.vlgmr.msra.gmra.mrb[44].mxu0 %vm797_vm3, %v1896_v41  ;;  %v1894_v26 = vmul.f32 %v3469_v31, %v3985_v42  ;;  %v2089_v63 = vpop.permute.xlu0 %2088  ;;  %v2096_v42 = vsel %vm592_vm2, %v2091_v37, 0 }
 0x7cf   : > { %3219 = vmatpush3.bf16.msra.mxu0 %v1995_v46  ;;  %3220 = vmatprep.mubr.msk.bf16.mxu0 %vm3517_vm1, %v3516_v28 }
 0x7d0   : > { %3230 = vmatprep.subr.bf16.mxu0 %v3516_v28 }
 0x7f3   : > { %v1879_v20 = vpop.xlane.xlu1 %1878 }
 0x7f4   : > { %3470 = vrcp.f32 %v1879_v20 }
 0x7f5   : > { %3472 = vrcp.f32 %v1870_v15 }
 0x7f7   : > { %v1873_v21 = vpop.xlane.xlu1 %1872 }
 0x7f8   : > { %3474 = vrcp.f32 %v1873_v21 }
 0x7fb   : > { %v2193_v56 = vpop.permute.xlu1 %2192 }
 0x7fc   : > { %v2198_v52 = vsel %vm592_vm2, %v2193_v56, 0 }
 0x7fe   : > { %v3471_v17 = vpop.eup %3470 }
 0x7ff   : > { %v1895_v45 = vmul.f32 %v3471_v17, %v3457_v0  ;;  %v3473_v54 = vpop.eup %3472  ;;  %v2244_v0 = vpop.permute.xlu1 %2243 }
 0x800   : > { %v1892_v58 = vmul.f32 %v3473_v54, %v3989_v49  ;;  %v2140_v49 = vpop.permute.xlu0 %2139  ;;  %v2959_v54 = vld [vmem:[%s4234_s2 + $0xc0] sm:$0xff] }
 0x801   : > { %v1899_v46 = vpack.c.bf16 %v1895_v45, %v1894_v26 }
 0x802   : > { %v3475_v55 = vpop.eup %3474 }
 0x803   : > { %v1893_v61 = vmul.f32 %v3475_v55, %v3459_v4  ;;  %3227 = vmatmul.mubr.msk.bf16.vlgmr.msra.gmra.mrb[56].mxu1 %vm797_vm3, %v1899_v46  ;;  %v2249_v4 = vsel %vm592_vm2, %v2244_v0, 0  ;;  %v2242_v50 = vpop.permute.xlu1 %2241  ;;  %v2961_v55 = vld [vmem:[%s4234_s2 + $0xd0] sm:$0xff] }
 0x804   : > { %3237 = vmatpush3.bf16.xpose.msra.mxu1 %v2147_v57  ;;  %3238 = vmatprep.mubr.msk.bf16.mxu1 %vm3517_vm1, %v3516_v28  ;;  %v2191_v48 = vpop.permute.xlu0 %2190  ;;  %v2960_v57 = vld [vmem:[%s4234_s2 + $0xc8] sm:$0xff] }
 0x805   : > { %v1898_v3 = vpack.c.bf16 %v1893_v61, %v1892_v58  ;;  %3248 = vmatprep.subr.bf16.mxu1 %v3516_v28 }
 0x807   : > { %3221 = vmatmul.mubr.msk.bf16.vlgmr.msra.gmra.mrb[48].mxu0 %vm797_vm3, %v1898_v3 }
 0x808   : > { %3231 = vmatpush3.bf16.xpose.msra.mxu0 %v2096_v42  ;;  %3232 = vmatprep.mubr.msk.bf16.mxu0 %vm3517_vm1, %v3516_v28 }
 0x809   : > { %3242 = vmatprep.subr.bf16.mxu0 %v3516_v28 }
 0x80b   : > { %3239 = vmatmul.mubr.msk.bf16.vlgmr.msra.gmra.mrb[60].mxu1 %vm592_vm2, %v2140_v49 }
 0x80c   : > { %3249 = vmatpush3.bf16.xpose.msra.mxu1 %v2249_v4  ;;  %3250 = vmatprep.mubr.msk.bf16.mxu1 %vm3517_vm1, %v3516_v28  ;;  %v2962_v4 = vld [vmem:[%s4234_s2 + $0xd8] sm:$0xff] }
 0x80d   : > { %3260 = vmatprep.subr.bf16.mxu1 %v3516_v28 }
 0x80f   : > { %3233 = vmatmul.mubr.msk.bf16.vlgmr.msra.gmra.mrb[52].mxu0 %vm592_vm2, %v2089_v63 }
 0x810   : > { %3243 = vmatpush3.bf16.xpose.msra.mxu0 %v2198_v52  ;;  %3244 = vmatprep.mubr.msk.bf16.mxu0 %vm3517_vm1, %v3516_v28 }
 0x811   : > { %3254 = vmatprep.subr.bf16.mxu0 %v3516_v28 }
 0x813   : > { %3251 = vmatmul.mubr.msk.bf16.vlgmr.msra.gmra.mrb[64].mxu1 %vm592_vm2, %v2242_v50 }
 0x814   : > { %3262 = vmatprep.mubr.msk.bf16.mxu1 %vm3517_vm1, %v3516_v28 }
 0x817   : > { %3245 = vmatmul.mubr.msk.bf16.vlgmr.msra.gmra.mrb[56].mxu0 %vm592_vm2, %v2191_v48 }
 0x818   : > { %3256 = vmatprep.mubr.msk.bf16.mxu0 %vm3517_vm1, %v3516_v28 }
 0x89d   : > { %v4042_v53 = vpop.f32.mrb[52].mxu1 }
 0x89e   : > { %v3216_v44 = vpop.f32.mrb[53].mxu1 }
 0x89f   : > { %v4044_v6 = vpop.f32.mrb[54].mxu1 }
 0x8a0   : > { %v3329_v10 = vpack.i.bf16 %v4044_v6, %v4042_v53  ;;  %v3217_v5 = vpop.f32.mrb[55].mxu1 }
 0x8a1   : > { %v4048_v11 = vpop.f32.mrb[44].mxu0 }
 0x8a2   : > { %v3210_v9 = vpop.f32.mrb[45].mxu0 }
 0x8a3   : > { %v4050_v51 = vpop.f32.mrb[46].mxu0 }
 0x8a4   : > { %v3324_v13 = vpack.i.bf16 %v4050_v51, %v4048_v11  ;;  %v3211_v62 = vpop.f32.mrb[47].mxu0 }
 0x8d6   : > { %v4054_v2 = vpop.f32.mrb[56].mxu1 }
 0x8d7   : > { %v3228_v1 = vpop.f32.mrb[57].mxu1 }
 0x8d8   : > { %v4056_v41 = vpop.f32.mrb[58].mxu1 }
 0x8d9   : > { %v3359_v12 = vpack.i.bf16 %v4056_v41, %v4054_v2  ;;  %v3229_v14 = vpop.f32.mrb[59].mxu1 }
 0x8da   : > { %v4060_v15 = vpop.f32.mrb[48].mxu0  ;;  %v2963_v14 = vld [vmem:[%s4234_s2 + $0xe0] sm:$0xff] }
 0x8db   : > { %v3222_v20 = vpop.f32.mrb[49].mxu0 }
 0x8dc   : > { %v4062_v21 = vpop.f32.mrb[50].mxu0  ;;  %v2964_v20 = vld [vmem:[%s4234_s2 + $0xe8] sm:$0xff] }
 0x8dd   : > { %v3354_v31 = vpack.i.bf16 %v4062_v21, %v4060_v15  ;;  %v3223_v17 = vpop.f32.mrb[51].mxu0 }
 0x8de   : > { %v2183_v37 = vpop.f32.mrb[60].mxu1 }
 0x8df   : > { %v3240_v26 = vpop.f32.mrb[61].mxu1  ;;  %v2303_v3 = vadd.f32 %v2961_v55, %v2183_v37  ;;  %v2966_v37 = vld [vmem:[%s4234_s2 + $0xf8] sm:$0xff] }
 0x8e0   : > { %v2186_v45 = vpop.f32.mrb[62].mxu1 }
 0x8e1   : > { %v3241_v46 = vpop.f32.mrb[63].mxu1  ;;  %v2304_v5 = vadd.f32 %v2962_v4, %v2186_v45  ;;  %v2315_v62 = vsel %vm797_vm3, %v2303_v3, -inf }
 0x8e2   : > { %v2132_v56 = vpop.f32.mrb[52].mxu0 }
 0x8e3   : > { %v2301_v58 = vadd.f32 %v2959_v54, %v2132_v56  ;;  %v3234_v61 = vpop.f32.mrb[53].mxu0  ;;  %v2318_v55 = vsel %vm797_vm3, %v2304_v5, -inf  ;;  %v2965_v56 = vld [vmem:[%s4234_s2 + $0xf0] sm:$0xff] }
 0x8e4   : > { %v2135_v63 = vpop.f32.mrb[54].mxu0 }
 0x8e5   : > { %v2302_v42 = vadd.f32 %v2960_v57, %v2135_v63  ;;  %v3235_v0 = vpop.f32.mrb[55].mxu0  ;;  %v2309_v49 = vsel %vm797_vm3, %v2301_v58, -inf }
 0x8e6   : > { %v2285_v52 = vpop.f32.mrb[64].mxu1  ;;  %2310 = vmax.xlane.f32.xlu0 %v2309_v49 }
 0x8e7   : > { %v3252_v50 = vpop.f32.mrb[65].mxu1  ;;  %v2312_v48 = vsel %vm797_vm3, %v2302_v42, -inf  ;;  %v2307_v63 = vadd.f32 %v2965_v56, %v2285_v52 }
 0x8e8   : > { %v2288_v44 = vpop.f32.mrb[66].mxu1  ;;  %2313 = vmax.xlane.f32.xlu1 %v2312_v48 }
 0x8e9   : > { %v3253_v9 = vpop.f32.mrb[67].mxu1  ;;  %v4096_v57 = vadd.f32 %v2966_v37, %v2288_v44  ;;  %v2327_v4 = vsel %vm797_vm3, %v2307_v63, -inf }
 0x8ea   : > { %2316 = vmax.xlane.f32.xlu0 %v2315_v62  ;;  %v2234_v1 = vpop.f32.mrb[56].mxu0 }
 0x8eb   : > { %v3246_v17 = vpop.f32.mrb[57].mxu0  ;;  %v2305_v45 = vadd.f32 %v2963_v14, %v2234_v1  ;;  %v2330_v49 = vsel %vm797_vm3, %v4096_v57, -inf }
 0x8ec   : > { %v2237_v26 = vpop.f32.mrb[58].mxu0 }
 0x8ed   : > { %v4090_v54 = vadd.f32 %v2964_v20, %v2237_v26  ;;  %v3247_v46 = vpop.f32.mrb[59].mxu0  ;;  %v2321_v0 = vsel %vm797_vm3, %v2305_v45, -inf }
 0x8ee   : > { %2319 = vmax.xlane.f32.xlu0 %v2318_v55 }
 0x8ef   : > { %v2324_v61 = vsel %vm797_vm3, %v4090_v54, -inf }
 0x8f0   : > { %2325 = vmax.xlane.f32.xlu1 %v2324_v61 }
 0x8f2   : > { %2322 = vmax.xlane.f32.xlu0 %v2321_v0 }
 0x8f4   : > { %2331 = vmax.xlane.f32.xlu1 %v2330_v49 }
 0x8f6   : > { %2328 = vmax.xlane.f32.xlu0 %v2327_v4 }
 0x973   : > { %v2311_v50 = vpop.xlane.xlu0 %2310 }
 0x974   : > { %v2333_v48 = vsub.f32 %v2301_v58, %v2311_v50 }
 0x975   : > { %v2314_v9 = vpop.xlane.xlu1 %2313 }
 0x976   : > { %v2341_v1 = vmul.f32 1.442695, %v2333_v48  ;;  %v2334_v14 = vsub.f32 %v2302_v42, %v2314_v9 }
 0x977   : > { %v2317_v44 = vpop.xlane.xlu0 %2316 }
 0x978   : > { %v2335_v62 = vsub.f32 %v2303_v3, %v2317_v44  ;;  %v2343_v37 = vmul.f32 1.442695, %v2334_v14 }
 0x97a   : > { %v2345_v20 = vmul.f32 1.442695, %v2335_v62 }
 0x97b   : > { %v2320_v17 = vpop.xlane.xlu0 %2319 }
 0x97c   : > { %3476 = vpow2.f32 %v2345_v20  ;;  %v2336_v52 = vsub.f32 %v2304_v5, %v2320_v17 }
 0x97d   : > { %3478 = vpow2.f32 %v2341_v1  ;;  %v2326_v1 = vpop.xlane.xlu1 %2325 }
 0x97e   : > { %v2347_v26 = vmul.f32 1.442695, %v2336_v52 }
 0x97f   : > { %v2323_v46 = vpop.xlane.xlu0 %2322 }
 0x980   : > { %3480 = vpow2.f32 %v2347_v26  ;;  %v2337_v55 = vsub.f32 %v2305_v45, %v2323_v46 }
 0x981   : > { %3482 = vpow2.f32 %v2343_v37  ;;  %v2332_v14 = vpop.xlane.xlu1 %2331 }
 0x982   : > { %v2349_v58 = vmul.f32 1.442695, %v2337_v55  ;;  %v2340_v20 = vsub.f32 %v4096_v57, %v2332_v14 }
 0x983   : > { %v2329_v56 = vpop.xlane.xlu0 %2328 }
 0x984   : > { %v2339_v61 = vsub.f32 %v2307_v63, %v2329_v56 }
 0x986   : > { %v4104_v0 = vpop.eup %3476  ;;  %v2353_v49 = vmul.f32 1.442695, %v2339_v61 }
 0x987   : > { %v2363_v3 = vsel %vm797_vm3, %v4104_v0, 0.0  ;;  %v4108_v42 = vpop.eup %3478 }
 0x988   : > { %3484 = vpow2.f32 %v2353_v49  ;;  %2364 = vadd.xlane.f32.xlu0 %v2363_v3  ;;  %v2357_v4 = vsel %vm797_vm3, %v4108_v42, 0.0 }
 0x989   : > { %3486 = vpow2.f32 %v2349_v58 }
 0x98a   : > { %v3481_v5 = vpop.eup %3480 }
 0x98b   : > { %v2366_v45 = vsel %vm797_vm3, %v3481_v5, 0.0  ;;  %v3483_v50 = vpop.eup %3482 }
 0x98c   : > { %2358 = vadd.xlane.f32.xlu0 %v2357_v4  ;;  %2367 = vadd.xlane.f32.xlu1 %v2366_v45  ;;  %v2360_v63 = vsel %vm797_vm3, %v3483_v50, 0.0  ;;  %v3378_v4 = vld [vmem:[%s4239_s7] sm:$0xff]   ;;  %v3379_v45 = vld [vmem:[%s4239_s7 + $0x8] sm:$0xff]  }
 0x990   : > { %2361 = vadd.xlane.f32.xlu1 %v2360_v63 }
 0x992   : > { %v4114_v48 = vpop.eup %3484 }
 0x993   : > { %v2375_v9 = vsel %vm797_vm3, %v4114_v48, 0.0  ;;  %v4118_v44 = vpop.eup %3486 }
 0x994   : > { %2376 = vadd.xlane.f32.xlu0 %v2375_v9  ;;  %v2369_v62 = vsel %vm797_vm3, %v4118_v44, 0.0 }
 0x998   : > { %2370 = vadd.xlane.f32.xlu0 %v2369_v62 }
 0x9a1   : > { %2448 = vrot.lane.b32.xlu1 %v3646_v59, %s3524_s25  ;;  %v2338_v59 = vsub.f32 %v4090_v54, %v2326_v1 }
 0x9a5   : > { %2495 = vrot.lane.b32.xlu1 %v3658_v8, %s3524_s25  ;;  %v2355_v8 = vmul.f32 1.442695, %v2340_v20 }
 0x9a7   : > { %3488 = vpow2.f32 %v2355_v8 }
 0x9ae   : > { %2401 = vrot.lane.b32.xlu0 %v3648_v60, %s3524_s25  ;;  %v2351_v60 = vmul.f32 1.442695, %v2338_v59 }
 0x9b0   : > { %3490 = vpow2.f32 %v2351_v60 }
 0x9b1   : > { %v3489_v22 = vpop.eup %3488 }
 0x9b2   : > { %3315 = vrot.lane.b32.xlu0 %v3314_v24, %s3525_s26  ;;  %v2378_v23 = vsel %vm797_vm3, %v3489_v22, 0.0 }
 0x9b6   : > { %3325 = vrot.lane.b32.xlu0 %v3324_v13, %s3526_s27 }
 0x9ba   : > { %3335 = vrot.lane.b32.xlu0 %v3334_v47, %s3525_s26  ;;  %v3491_v24 = vpop.eup %3490 }
 0x9bb   : > { %v2372_v57 = vsel %vm797_vm3, %v3491_v24, 0.0 }
 0x9c9   : > { %2379 = vadd.xlane.f32.xlu1 %v2378_v23 }
 0x9cd   : > { %2373 = vadd.xlane.f32.xlu1 %v2372_v57 }
 0x9de   : > { %2542 = vrot.lane.b32.xlu1 %v3656_v7, %s3524_s25 }
 0x9e2   : > { %3320 = vrot.lane.b32.xlu1 %v3319_v19, %s3525_s26 }
 0x9e6   : > { %3330 = vrot.lane.b32.xlu1 %v3329_v10, %s3526_s27 }
 0x9ea   : > { %3340 = vrot.lane.b32.xlu1 %v3339_v35, %s3525_s26 }
 0xa15   : > { %v2365_v39 = vpop.xlane.xlu0 %2364 }
 0xa16   : > { %3492 = vrcp.f32 %v2365_v39 }
 0xa19   : > { %v2359_v43 = vpop.xlane.xlu0 %2358  ;;  %v2368_v47 = vpop.xlane.xlu1 %2367 }
 0xa1a   : > { %3494 = vrcp.f32 %v2368_v47 }
 0xa1b   : > { %3496 = vrcp.f32 %v2359_v43 }
 0xa1d   : > { %v2362_v7 = vpop.xlane.xlu1 %2361 }
 0xa1e   : > { %3498 = vrcp.f32 %v2362_v7 }
 0xa20   : > { %v3493_v18 = vpop.eup %3492 }
 0xa21   : > { %v2377_v11 = vpop.xlane.xlu0 %2376  ;;  %v2449_v16 = vpop.permute.xlu1 %2448  ;;  %v2391_v29 = vmul.f32 %v3493_v18, %v4104_v0 }
 0xa22   : > { %3261 = vmatpush3.bf16.msra.mxu1 %v2449_v16  ;;  %3500 = vrcp.f32 %v2377_v11 }
 0xa23   : > { %3272 = vmatprep.subr.bf16.mxu1 %v3516_v28 }
 0xa24   : > { %v3495_v19 = vpop.eup %3494 }
 0xa25   : > { %v2371_v53 = vpop.xlane.xlu0 %2370  ;;  %v3497_v6 = vpop.eup %3496  ;;  %v2392_v33 = vmul.f32 %v3495_v19, %v3481_v5 }
 0xa26   : > { %v2389_v51 = vmul.f32 %v3497_v6, %v4108_v42  ;;  %v2496_v52 = vpop.permute.xlu1 %2495 }
 0xa27   : > { %v2398_v10 = vpack.c.bf16 %v2392_v33, %v2391_v29 }
 0xa28   : > { %v3499_v35 = vpop.eup %3498 }
 0xa29   : > { %v2390_v13 = vmul.f32 %v3499_v35, %v3483_v50  ;;  %v2402_v54 = vpop.permute.xlu0 %2401  ;;  %3263 = vmatmul.mubr.msk.bf16.vlgmr.msra.gmra.mrb[68].mxu1 %vm797_vm3, %v2398_v10 }
 0xa2a   : > { %3255 = vmatpush3.bf16.msra.mxu0 %v2402_v54  ;;  %3274 = vmatprep.mubr.msk.bf16.mxu1 %vm3517_vm1, %v3516_v28 }
 0xa2b   : > { %3266 = vmatprep.subr.bf16.mxu0 %v3516_v28  ;;  %v2397_v17 = vpack.c.bf16 %v2390_v13, %v2389_v51 }
 0xa2c   : > { %v3501_v55 = vpop.eup %3500 }
 0xa2d   : > { %3257 = vmatmul.mubr.msk.bf16.vlgmr.msra.gmra.mrb[60].mxu0 %vm797_vm3, %v2397_v17  ;;  %v2395_v61 = vmul.f32 %v3501_v55, %v4114_v48  ;;  %v3316_v2 = vpop.permute.xlu0 %3315 }
 0xa2e   : > { %3267 = vmatpush3.bf16.msra.mxu0 %v2496_v52  ;;  %3268 = vmatprep.mubr.msk.bf16.mxu0 %vm3517_vm1, %v3516_v28  ;;  %v3318_v19 = vunpack.i.h.bf16 %v3316_v2  ;;  %v3317_v6 = vunpack.i.l.bf16 %v3316_v2 }
 0xa2f   : > { %3278 = vmatprep.subr.bf16.mxu0 %v3378_v4 }
 0xa56   : > { %v2380_v37 = vpop.xlane.xlu1 %2379 }
 0xa57   : > { %3502 = vrcp.f32 %v2380_v37  ;;  %v2686_v37 = vsel %vm592_vm2, %v3792_v32, %v3318_v19 }
 0xa58   : > { %3504 = vrcp.f32 %v2371_v53 }
 0xa5a   : > { %v2374_v26 = vpop.xlane.xlu1 %2373 }
 0xa5b   : > { %3506 = vrcp.f32 %v2374_v26 }
 0xa5e   : > { %v2543_v46 = vpop.permute.xlu1 %2542 }
 0xa5f   : > { %3273 = vmatpush3.bf16.msra.mxu1 %v2543_v46 }
 0xa61   : > { %v3503_v56 = vpop.eup %3502 }
 0xa62   : > { %v2396_v0 = vmul.f32 %v3503_v56, %v3489_v22  ;;  %v3505_v58 = vpop.eup %3504  ;;  %v3321_v11 = vpop.permute.xlu1 %3320 }
 0xa63   : > { %v2393_v42 = vmul.f32 %v3505_v58, %v4118_v44  ;;  %v3323_v18 = vunpack.i.h.bf16 %v3321_v11  ;;  %v3322_v15 = vunpack.i.l.bf16 %v3321_v11 }
 0xa64   : > { %v2400_v49 = vpack.c.bf16 %v2396_v0, %v2395_v61 }
 0xa65   : > { %v3507_v3 = vpop.eup %3506  ;;  %v2688_v10 = vsel %vm592_vm2, %v3788_v27, %v3323_v18  ;;  %v2687_v51 = vsel %vm592_vm2, %v3786_v25, %v3322_v15  ;;  %v2685_v27 = vsel %vm592_vm2, %v3790_v30, %v3317_v6 }
 0xa66   : > { %v2394_v5 = vmul.f32 %v3507_v3, %v3491_v24  ;;  %3275 = vmatmul.mubr.msk.bf16.vlgmr.msra.gmra.mrb[72].mxu1 %vm797_vm3, %v2400_v49  ;;  %v3331_v41 = vpop.permute.xlu1 %3330 }
 0xa67   : > { %v3333_v21 = vunpack.i.h.bf16 %v3331_v41 }
 0xa68   : > { %v2399_v28 = vpack.c.bf16 %v2394_v5, %v2393_v42 }
 0xa69   : > { %v2696_v52 = vsel %vm797_vm3, %v2688_v10, %v3333_v21 }
 0xa6a   : > { %3269 = vmatmul.mubr.msk.bf16.vlgmr.msra.gmra.mrb[64].mxu0 %vm797_vm3, %v2399_v28  ;;  %v3341_v16 = vpop.permute.xlu1 %3340 }
 0xa6b   : > { %3279 = vmatpush3.bf16.msra.mxu0 %v3378_v4  ;;  %v3343_v5 = vunpack.i.h.bf16 %v3341_v16  ;;  %v3342_v28 = vunpack.i.l.bf16 %v3341_v16 }
 0xa6c   : > { %3280 = vmatprep.subr.bf16.mxu0 %v3379_v45 }
 0xa6f   : > { %3281 = vmatpush3.bf16.msra.mxu0 %v3379_v45 }
 0xafc   : > { %v2488_v50 = vpop.f32.mrb[68].mxu1 }
 0xafd   : > { %v3264_v63 = vpop.f32.mrb[69].mxu1 }
 0xafe   : > { %v2491_v48 = vpop.f32.mrb[70].mxu1 }
 0xaff   : > { %v3344_v9 = vpack.i.bf16 %v2491_v48, %v2488_v50  ;;  %v3265_v44 = vpop.f32.mrb[71].mxu1 }
 0xb00   : > { %v2441_v62 = vpop.f32.mrb[60].mxu0  ;;  %v2691_v44 = vsel %vm592_vm2, %v3794_v34, %v3342_v28 }
 0xb01   : > { %v3258_v1 = vpop.f32.mrb[61].mxu0  ;;  %3345 = vrot.lane.b32.xlu1 %v3344_v9, %s3527_s12  ;;  %v2692_v9 = vsel %vm592_vm2, %v3796_v36, %v3343_v5 }
 0xb02   : > { %v2444_v14 = vpop.f32.mrb[62].mxu0 }
 0xb03   : > { %v3349_v20 = vpack.i.bf16 %v2444_v14, %v2441_v62  ;;  %v3259_v59 = vpop.f32.mrb[63].mxu0 }
 0xb05   : > { %3350 = vrot.lane.b32.xlu0 %v3349_v20, %s3527_s12  ;;  %3360 = vrot.lane.b32.xlu1 %v3359_v12, %s3526_s27  ;;  %v3326_v12 = vpop.permute.xlu0 %3325 }
 0xb06   : > { %v3328_v29 = vunpack.i.h.bf16 %v3326_v12  ;;  %v3327_v33 = vunpack.i.l.bf16 %v3326_v12 }
 0xb08   : > { %v2693_v0 = vsel %vm797_vm3, %v2685_v27, %v3327_v33  ;;  %v2694_v58 = vsel %vm797_vm3, %v2686_v37, %v3328_v29 }
 0xb09   : > { %3355 = vrot.lane.b32.xlu0 %v3354_v31, %s3526_s27  ;;  %v3332_v31 = vunpack.i.l.bf16 %v3331_v41  ;;  %v3336_v53 = vpop.permute.xlu0 %3335 }
 0xb0a   : > { %v3338_v50 = vunpack.i.h.bf16 %v3336_v53  ;;  %v3337_v63 = vunpack.i.l.bf16 %v3336_v53 }
 0xb0b   : > { %v2695_v17 = vsel %vm797_vm3, %v2687_v51, %v3332_v31 }
 0xb0c   : > { %v2690_v36 = vsel %vm592_vm2, %v3800_v40, %v3338_v50  ;;  %v2689_v34 = vsel %vm592_vm2, %v3798_v38, %v3337_v63  ;;  %v2971_v40 = vld [vmem:[%s4240_s8] ss:$0 sm:$0xff] }
 0xb39   : > { %v2582_v8 = vpop.f32.mrb[72].mxu1 }
 0xb3a   : > { %v3276_v60 = vpop.f32.mrb[73].mxu1 }
 0xb3b   : > { %v2585_v22 = vpop.f32.mrb[74].mxu1 }
 0xb3c   : > { %v3369_v23 = vpack.i.bf16 %v2585_v22, %v2582_v8  ;;  %v3277_v24 = vpop.f32.mrb[75].mxu1 }
 0xb3d   : > { %v2535_v57 = vpop.f32.mrb[64].mxu0 }
 0xb3e   : > { %3370 = vrot.lane.b32.xlu1 %v3369_v23, %s3527_s12  ;;  %v3270_v39 = vpop.f32.mrb[65].mxu0 }
 0xb3f   : > { %v2538_v43 = vpop.f32.mrb[66].mxu0 }
 0xb40   : > { %v3364_v47 = vpack.i.bf16 %v2538_v43, %v2535_v57  ;;  %v3271_v7 = vpop.f32.mrb[67].mxu0 }
 0xb42   : > { %3365 = vrot.lane.b32.xlu0 %v3364_v47, %s3527_s12 }
 0xb73   : > { %v3346_v35 = vpop.permute.xlu1 %3345 }
 0xb74   : > { %v3348_v13 = vunpack.i.h.bf16 %v3346_v35  ;;  %v3347_v54 = vunpack.i.l.bf16 %v3346_v35 }
 0xb76   : > { %v2704_v26 = vsel %vm2701_vm4, %v2695_v17, %v3347_v54  ;;  %v2705_v46 = vsel %vm2701_vm4, %v2696_v52, %v3348_v13 }
 0xb77   : > { %v3351_v55 = vpop.permute.xlu0 %3350  ;;  %v2711_v56 = vpack.c.bf16 %v2705_v46, %v2704_v26  ;;  %v3361_v42 = vpop.permute.xlu1 %3360 }
 0xb78   : > { %v3353_v61 = vunpack.i.h.bf16 %v3351_v55  ;;  %v3352_v25 = vunpack.i.l.bf16 %v3351_v55  ;;  %v3363_v30 = vunpack.i.h.bf16 %v3361_v42  ;;  %v3362_v4 = vunpack.i.l.bf16 %v3361_v42 }
 0xb7a   : > { %v2703_v49 = vsel %vm2701_vm4, %v2694_v58, %v3353_v61  ;;  %v2702_v3 = vsel %vm2701_vm4, %v2693_v0, %v3352_v25  ;;  %v2699_v14 = vsel %vm797_vm3, %v2691_v44, %v3362_v4  ;;  %v2700_v20 = vsel %vm797_vm3, %v2692_v9, %v3363_v30 }
 0xb7b   : > { %v2710_v32 = vpack.c.bf16 %v2703_v49, %v2702_v3  ;;  %v3356_v45 = vpop.permute.xlu0 %3355 }
 0xb7c   : > { %v3358_v59 = vunpack.i.h.bf16 %v3356_v45  ;;  %v3357_v8 = vunpack.i.l.bf16 %v3356_v45 }
 0xb7d   : > { %3282 = vmatprep.mubr.msk.bf16.mxu0 %vm406_vm0, %v2710_v32 }
 0xb7e   : > { %3283 = vmatmul.mubr.msk.bf16.vlgmr.msra.gmra.mrb[68].mxu0 %vm406_vm0, %v2711_v56  ;;  %v2698_v43 = vsel %vm797_vm3, %v2690_v36, %v3358_v59  ;;  %v2697_v47 = vsel %vm797_vm3, %v2689_v34, %v3357_v8 }
 0xbb0   : > { %v3371_v48 = vpop.permute.xlu1 %3370 }
 0xbb1   : > { %v3373_v62 = vunpack.i.h.bf16 %v3371_v48  ;;  %v3372_v1 = vunpack.i.l.bf16 %v3371_v48 }
 0xbb3   : > { %v2708_v60 = vsel %vm2701_vm4, %v2699_v14, %v3372_v1  ;;  %v2709_v22 = vsel %vm2701_vm4, %v2700_v20, %v3373_v62 }
 0xbb4   : > { %v2713_v23 = vpack.c.bf16 %v2709_v22, %v2708_v60  ;;  %v3366_v24 = vpop.permute.xlu0 %3365 }
 0xbb5   : > { %v3368_v57 = vunpack.i.h.bf16 %v3366_v24  ;;  %v3367_v39 = vunpack.i.l.bf16 %v3366_v24 }
 0xbb7   : > { %v2707_v7 = vsel %vm2701_vm4, %v2698_v43, %v3368_v57  ;;  %v2706_v11 = vsel %vm2701_vm4, %v2697_v47, %v3367_v39 }
 0xbb8   : > { %v2712_v2 = vpack.c.bf16 %v2707_v7, %v2706_v11 }
 0xbba   : > { %3286 = vmatprep.mubr.msk.bf16.mxu0 %vm406_vm0, %v2712_v2 }
 0xbbb   : > { %3287 = vmatmul.mubr.msk.bf16.gmra.mrb[72].mxu0 %vm406_vm0, %v2713_v23 }
 0xc51   : > { %v3284_v38 = vpop.f32.mrb[68].mxu0 }
 0xc52   : > { %v2792_v41 = vadd.f32 %v3284_v38, %v2971_v40  ;;  %v2783_v12 = vpop.f32.mrb[69].mxu0 }
 0xc53   : > { %v2784_v16 = vadd.f32 %v2971_v40, %v2783_v12  ;;  %v3285_v18 = vpop.f32.mrb[70].mxu0 }
 0xc54   : > { %2816 = vst.msk [vmem:[%s356_s17 + $0x10] sm:$0xff] %vm406_vm0, %v2792_v41  ;;  %v2795_v15 = vadd.f32 %v3285_v18, %v2971_v40  ;;  %v2786_v21 = vpop.f32.mrb[71].mxu0 }
 0xc55   : > { %2814 = vst.msk [vmem:[%s356_s17] sm:$0xff] %vm406_vm0, %v2784_v16  ;;  %v2787_v31 = vadd.f32 %v2971_v40, %v2786_v21 }
 0xc56   : > { %2817 = vst.msk [vmem:[%s356_s17 + $0x18] sm:$0xff] %vm406_vm0, %v2795_v15 }
 0xc57   : > { %2815 = vst.msk [vmem:[%s356_s17 + $0x8] sm:$0xff] %vm406_vm0, %v2787_v31 }
 0xc8e   : > { %v3288_v19 = vpop.f32.mrb[72].mxu0 }
 0xc8f   : > { %v2808_v53 = vadd.f32 %v3288_v19, %v2971_v40  ;;  %v2799_v6 = vpop.f32.mrb[73].mxu0 }
 0xc90   : > { %v2800_v29 = vadd.f32 %v2971_v40, %v2799_v6  ;;  %v3289_v33 = vpop.f32.mrb[74].mxu0 }
 0xc91   : > { %2820 = vst.msk [vmem:[%s356_s17 + $0x30] sm:$0xff] %vm406_vm0, %v2808_v53  ;;  %v2811_v35 = vadd.f32 %v3289_v33, %v2971_v40  ;;  %v2802_v10 = vpop.f32.mrb[75].mxu0 }
 0xc92   : > { %2818 = vst.msk [vmem:[%s356_s17 + $0x20] sm:$0xff] %vm406_vm0, %v2800_v29  ;;  %v2803_v51 = vadd.f32 %v2971_v40, %v2802_v10 }
 0xc93   : > { %2821 = vst.msk [vmem:[%s356_s17 + $0x38] sm:$0xff] %vm406_vm0, %v2811_v35 }
 0xc94   : > { %2819 = vst.msk [vmem:[%s356_s17 + $0x28] sm:$0xff] %vm406_vm0, %v2803_v51 }
 0xc95 PF: > { %s19_s30 = sadd.s32 1, %s3514_s30  }
 0xc96   : > { %p16_p4 = scmp.ge.s32.totalorder %s19_s30, 4  }
 0xc98   :  { %18 = sbr.rel (!%p16_p4) target bundleno = 1 (0x1), region = 92 }

</bundles_post_ra>
